<compile_context>
chip_gen: v7x
topology: tpu7x:2x2x1
jax: 0.10.0
libtpu: 0.0.40
codegen_flags: <defaults>
</compile_context>

<pallas_src>
import jax
import jax.numpy as jnp
from jax.experimental import pallas as pl
from jax.experimental.pallas import tpu as pltpu

INPUT_SIZE = 38
EXTRA = 7                     # y_prev feature dim (concatenated inside the PyTorch module)
FEAT = INPUT_SIZE + EXTRA     # 45
HIDDEN = 16
MID = 16
OUT = 7


def lstm_kernel(x_ref, y_ref, w_ref, misc_ref, out_ref):
    B, T, _ = x_ref.shape
    H = HIDDEN

    # ---- static slices of the packed parameter operands (one-time, off the chain) ----
    wx = w_ref[0:INPUT_SIZE, :]                    # (38, 4H) bf16
    wy = w_ref[INPUT_SIZE:FEAT, :]                 # (7,  4H) bf16
    w_hh = w_ref[FEAT:FEAT + H, :]                 # (16, 4H) bf16, stays resident
    b = misc_ref[0:1, :]                           # (1,  4H) f32
    w_head = misc_ref[1:1 + H, 0:OUT]              # (16, 7)  f32  (linear1 folded into linear2)
    b_head = misc_ref[1 + H:2 + H, 0:OUT]          # (1,  7)  f32

    # ---- hoisted input projection: one batched matmul covering all T timesteps ----
    xf = x_ref[...].reshape(B * T, INPUT_SIZE).astype(jnp.bfloat16)
    yf = y_ref[...].reshape(B * T, EXTRA).astype(jnp.bfloat16)
    gx = (jnp.dot(xf, wx, preferred_element_type=jnp.float32)
          + jnp.dot(yf, wy, preferred_element_type=jnp.float32)
          + b)                                     # (B*T, 4H) f32, bias added once
    gx = gx.reshape(B, T, 4 * H)

    # Relayout to time-major ONCE, off the serial chain: each step then reads a
    # contiguous (B, 4H) tile instead of gathering sublane t from 4H-wide batch tiles.
    gx_tm = jnp.stack([gx[:, t, :] for t in range(T)], axis=0)   # (T, B, 4H)

    h = jnp.zeros((B, H), jnp.float32)
    c = jnp.zeros((B, H), jnp.float32)

    # ---- serial recurrence: only h @ W_hh is on the critical path ----
    for t in range(T):                             # T static -> fully unrolled
        g = gx_tm[t] + jnp.dot(h.astype(jnp.bfloat16), w_hh,
                               preferred_element_type=jnp.float32)
        s = jax.nn.sigmoid(g)                      # one EUP pass over (B, 4H)
        u = jnp.tanh(g)                            # one EUP pass over (B, 4H)
        i_g = s[:, 0 * H:1 * H]
        f_g = s[:, 1 * H:2 * H]
        g_g = u[:, 2 * H:3 * H]
        o_g = s[:, 3 * H:4 * H]
        c = f_g * c + i_g * g_g
        h = o_g * jnp.tanh(c)

    # ---- fused head: linear2(linear1(h)); dropout layers are identity at inference ----
    pred = jnp.dot(h, w_head, preferred_element_type=jnp.float32) + b_head
    out_ref[...] = pred.astype(out_ref.dtype)


def module_lstm_forward(x, y_prev, packed):
    """x: (B, T, 38) f32, y_prev: (B, T, 7) f32, packed: prepare_params(...) -> (B, 7) f32.

    No per-call parameter math here — everything is precomputed in prepare_params().
    Best throughput when B is a multiple of 8 (fills all f32 sublanes).
    """
    B = x.shape[0]
    vmem = pl.BlockSpec(memory_space=pltpu.MemorySpace.VMEM)  # whole array in VMEM, no grid
    return pl.pallas_call(
        lstm_kernel,
        out_shape=jax.ShapeDtypeStruct((B, OUT), jnp.float32),
        in_specs=[vmem] * 4,
        out_specs=vmem,
    )(x, y_prev, packed["w_pack"], packed["misc"])


def prepare_params(p):
    """One-time (load-time) parameter prep: head fold + operand packing + bf16 cast.

    NOTE: real PyTorch checkpoints store weight_ih_l0 / weight_hh_l0 as (4H, F)/(4H, H)
    and two biases; transpose, split into (W_x, W_y) and sum the biases before this.
    """
    w_head = p["w1"] @ p["w2"]                         # (H, OUT)
    b_head = p["b1"] @ p["w2"] + p["b2"]               # (1, OUT)
    # Packed matmul weights, bf16 for guaranteed single-pass MXU matmuls.
    w_pack = jnp.concatenate([p["w_x"], p["w_y"], p["w_hh"]],
                             axis=0).astype(jnp.bfloat16)          # (61, 4H)
    # Packed bias + folded head, f32.
    misc = jnp.zeros((2 + HIDDEN, 4 * HIDDEN), jnp.float32)        # (18, 4H)
    misc = misc.at[0, :].set(p["b"][0])
    misc = misc.at[1:1 + HIDDEN, :OUT].set(w_head)
    misc = misc.at[1 + HIDDEN, :OUT].set(b_head[0])
    return {"w_pack": w_pack, "misc": misc}


def ref_forward(x, y_prev, params):
    """Pure-JAX f32 reference of the same forward pass (unfused, unpacked params)."""
    x1 = jnp.concatenate([x, y_prev], axis=2)
    w_ih = jnp.concatenate([params["w_x"], params["w_y"]], axis=0)
    B, T, _ = x1.shape
    H = HIDDEN
    h = jnp.zeros((B, H), jnp.float32)
    c = jnp.zeros((B, H), jnp.float32)
    for t in range(T):
        gates = x1[:, t, :] @ w_ih + h @ params["w_hh"] + params["b"]
        i_g = jax.nn.sigmoid(gates[:, :H])
        f_g = jax.nn.sigmoid(gates[:, H:2 * H])
        g_g = jnp.tanh(gates[:, 2 * H:3 * H])
        o_g = jax.nn.sigmoid(gates[:, 3 * H:])
        c = f_g * c + i_g * g_g
        h = o_g * jnp.tanh(c)
    z1 = h @ params["w1"] + params["b1"]
    return z1 @ params["w2"] + params["b2"]


def init_params(key):
    ks = jax.random.split(key, 8)
    s = 0.2
    return {
        "w_x":  s * jax.random.normal(ks[0], (INPUT_SIZE, 4 * HIDDEN), jnp.float32),
        "w_y":  s * jax.random.normal(ks[1], (EXTRA, 4 * HIDDEN), jnp.float32),
        "w_hh": s * jax.random.normal(ks[2], (HIDDEN, 4 * HIDDEN), jnp.float32),
        "b":    s * jax.random.normal(ks[3], (1, 4 * HIDDEN), jnp.float32),
        "w1":   s * jax.random.normal(ks[4], (HIDDEN, MID), jnp.float32),
        "b1":   s * jax.random.normal(ks[5], (1, MID), jnp.float32),
        "w2":   s * jax.random.normal(ks[6], (MID, OUT), jnp.float32),
        "b2":   s * jax.random.normal(ks[7], (1, OUT), jnp.float32),
    }


if __name__ == "__main__":
    key = jax.random.PRNGKey(0)
    kp, kx, ky = jax.random.split(key, 3)

    B, T = 8, 8                     # B multiple of 8 fills the f32 sublanes (free throughput)
    params = init_params(kp)
    packed = prepare_params(params)  # one-time: head fold + packing (NOT on the call path)

    x = jax.random.normal(kx, (B, T, INPUT_SIZE), jnp.float32)
    y_prev = jax.random.normal(ky, (B, T, EXTRA), jnp.float32)

    forward = jax.jit(module_lstm_forward)
    pred = jax.block_until_ready(forward(x, y_prev, packed))
    ref = jax.block_until_ready(ref_forward(x, y_prev, params))

    assert pred.shape == (B, OUT)
    # Kernel uses bf16 single-pass MXU matmuls (f32 accumulate) vs an f32 reference,
    # so the tolerance is loose but still catches structural/gate-order mistakes.
    assert jnp.allclose(pred, ref, atol=7e-2, rtol=7e-2), "mismatch vs JAX reference"

    print("KERNEL_OK")
</pallas_src>

<mosaic_0001>
module attributes {stable_mosaic.version = 11 : i64} {
  func.func @lstm_kernel(%arg0: memref<8x8x38xf32, #tpu.memory_space<vmem>>, %arg1: memref<8x8x7xf32, #tpu.memory_space<vmem>>, %arg2: memref<61x64xbf16, #tpu.memory_space<vmem>>, %arg3: memref<18x64xf32, #tpu.memory_space<vmem>>, %arg4: memref<8x7xf32, #tpu.memory_space<vmem>>) attributes {dimension_semantics = [], scalar_prefetch = 0 : i64, scratch_operands = 0 : i64, tpu.core_type = #tpu.core_type<tc>} {
    %c0 = arith.constant 0 : index
    %c0_0 = arith.constant 0 : index
    %0 = vector.load %arg2[%c0, %c0_0] : memref<61x64xbf16, #tpu.memory_space<vmem>>, vector<38x64xbf16>
    %c38 = arith.constant 38 : index
    %c0_1 = arith.constant 0 : index
    %1 = vector.load %arg2[%c38, %c0_1] : memref<61x64xbf16, #tpu.memory_space<vmem>>, vector<7x64xbf16>
    %c45 = arith.constant 45 : index
    %c0_2 = arith.constant 0 : index
    %2 = vector.load %arg2[%c45, %c0_2] : memref<61x64xbf16, #tpu.memory_space<vmem>>, vector<16x64xbf16>
    %c0_3 = arith.constant 0 : index
    %c0_4 = arith.constant 0 : index
    %3 = vector.load %arg3[%c0_3, %c0_4] : memref<18x64xf32, #tpu.memory_space<vmem>>, vector<1x64xf32>
    %c1 = arith.constant 1 : index
    %c0_5 = arith.constant 0 : index
    %4 = vector.load %arg3[%c1, %c0_5] : memref<18x64xf32, #tpu.memory_space<vmem>>, vector<16x7xf32>
    %c17 = arith.constant 17 : index
    %c0_6 = arith.constant 0 : index
    %5 = vector.load %arg3[%c17, %c0_6] : memref<18x64xf32, #tpu.memory_space<vmem>>, vector<1x7xf32>
    %c0_7 = arith.constant 0 : index
    %c0_8 = arith.constant 0 : index
    %c0_9 = arith.constant 0 : index
    %6 = vector.load %arg0[%c0_7, %c0_8, %c0_9] : memref<8x8x38xf32, #tpu.memory_space<vmem>>, vector<8x8x38xf32>
    %7 = vector.shape_cast %6 : vector<8x8x38xf32> to vector<64x38xf32>
    %8 = arith.truncf %7 : vector<64x38xf32> to vector<64x38xbf16>
    %c0_10 = arith.constant 0 : index
    %c0_11 = arith.constant 0 : index
    %c0_12 = arith.constant 0 : index
    %9 = vector.load %arg1[%c0_10, %c0_11, %c0_12] : memref<8x8x7xf32, #tpu.memory_space<vmem>>, vector<8x8x7xf32>
    %10 = vector.shape_cast %9 : vector<8x8x7xf32> to vector<64x7xf32>
    %11 = arith.truncf %10 : vector<64x7xf32> to vector<64x7xbf16>
    %cst = arith.constant dense<0.000000e+00> : vector<64x64xf32>
    %12 = tpu.matmul %8, %0, %cst {dimension_numbers = #tpu.dot_dimension_numbers<[1], [0], [0], [1], [0, 0, 1, 1], [], []>} : vector<64x38xbf16>, vector<38x64xbf16>, vector<64x64xf32> -> vector<64x64xf32>
    %cst_13 = arith.constant dense<0.000000e+00> : vector<64x64xf32>
    %13 = tpu.matmul %11, %1, %cst_13 {dimension_numbers = #tpu.dot_dimension_numbers<[1], [0], [0], [1], [0, 0, 1, 1], [], []>} : vector<64x7xbf16>, vector<7x64xbf16>, vector<64x64xf32> -> vector<64x64xf32>
    %14 = arith.addf %12, %13 : vector<64x64xf32>
    %15 = vector.broadcast %3 : vector<1x64xf32> to vector<64x64xf32>
    %16 = arith.addf %14, %15 : vector<64x64xf32>
    %17 = vector.shape_cast %16 : vector<64x64xf32> to vector<8x8x64xf32>
    %18 = vector.extract_strided_slice %17 {offsets = [0, 0, 0], sizes = [8, 1, 64], strides = [1, 1, 1]} : vector<8x8x64xf32> to vector<8x1x64xf32>
    %19 = vector.shape_cast %18 : vector<8x1x64xf32> to vector<8x64xf32>
    %20 = vector.extract_strided_slice %17 {offsets = [0, 1, 0], sizes = [8, 1, 64], strides = [1, 1, 1]} : vector<8x8x64xf32> to vector<8x1x64xf32>
    %21 = vector.shape_cast %20 : vector<8x1x64xf32> to vector<8x64xf32>
    %22 = vector.extract_strided_slice %17 {offsets = [0, 2, 0], sizes = [8, 1, 64], strides = [1, 1, 1]} : vector<8x8x64xf32> to vector<8x1x64xf32>
    %23 = vector.shape_cast %22 : vector<8x1x64xf32> to vector<8x64xf32>
    %24 = vector.extract_strided_slice %17 {offsets = [0, 3, 0], sizes = [8, 1, 64], strides = [1, 1, 1]} : vector<8x8x64xf32> to vector<8x1x64xf32>
    %25 = vector.shape_cast %24 : vector<8x1x64xf32> to vector<8x64xf32>
    %26 = vector.extract_strided_slice %17 {offsets = [0, 4, 0], sizes = [8, 1, 64], strides = [1, 1, 1]} : vector<8x8x64xf32> to vector<8x1x64xf32>
    %27 = vector.shape_cast %26 : vector<8x1x64xf32> to vector<8x64xf32>
    %28 = vector.extract_strided_slice %17 {offsets = [0, 5, 0], sizes = [8, 1, 64], strides = [1, 1, 1]} : vector<8x8x64xf32> to vector<8x1x64xf32>
    %29 = vector.shape_cast %28 : vector<8x1x64xf32> to vector<8x64xf32>
    %30 = vector.extract_strided_slice %17 {offsets = [0, 6, 0], sizes = [8, 1, 64], strides = [1, 1, 1]} : vector<8x8x64xf32> to vector<8x1x64xf32>
    %31 = vector.shape_cast %30 : vector<8x1x64xf32> to vector<8x64xf32>
    %32 = vector.extract_strided_slice %17 {offsets = [0, 7, 0], sizes = [8, 1, 64], strides = [1, 1, 1]} : vector<8x8x64xf32> to vector<8x1x64xf32>
    %33 = vector.shape_cast %32 : vector<8x1x64xf32> to vector<8x64xf32>
    %34 = vector.shape_cast %19 : vector<8x64xf32> to vector<1x8x64xf32>
    %35 = vector.shape_cast %21 : vector<8x64xf32> to vector<1x8x64xf32>
    %36 = vector.shape_cast %23 : vector<8x64xf32> to vector<1x8x64xf32>
    %37 = vector.shape_cast %25 : vector<8x64xf32> to vector<1x8x64xf32>
    %38 = vector.shape_cast %27 : vector<8x64xf32> to vector<1x8x64xf32>
    %39 = vector.shape_cast %29 : vector<8x64xf32> to vector<1x8x64xf32>
    %40 = vector.shape_cast %31 : vector<8x64xf32> to vector<1x8x64xf32>
    %41 = vector.shape_cast %33 : vector<8x64xf32> to vector<1x8x64xf32>
    %42 = tpu.concatenate %34, %35, %36, %37, %38, %39, %40, %41 in 0 : vector<1x8x64xf32>, vector<1x8x64xf32>, vector<1x8x64xf32>, vector<1x8x64xf32>, vector<1x8x64xf32>, vector<1x8x64xf32>, vector<1x8x64xf32>, vector<1x8x64xf32> -> vector<8x8x64xf32>
    %cst_14 = arith.constant 0.000000e+00 : f32
    %43 = vector.broadcast %cst_14 : f32 to vector<8x16xf32>
    %cst_15 = arith.constant 0.000000e+00 : f32
    %44 = vector.broadcast %cst_15 : f32 to vector<8x16xf32>
    %45 = vector.extract_strided_slice %42 {offsets = [0, 0, 0], sizes = [1, 8, 64], strides = [1, 1, 1]} : vector<8x8x64xf32> to vector<1x8x64xf32>
    %46 = vector.shape_cast %45 : vector<1x8x64xf32> to vector<8x64xf32>
    %47 = arith.truncf %43 : vector<8x16xf32> to vector<8x16xbf16>
    %cst_16 = arith.constant dense<0.000000e+00> : vector<8x64xf32>
    %48 = tpu.matmul %47, %2, %cst_16 {dimension_numbers = #tpu.dot_dimension_numbers<[1], [0], [0], [1], [0, 0, 1, 1], [], []>} : vector<8x16xbf16>, vector<16x64xbf16>, vector<8x64xf32> -> vector<8x64xf32>
    %49 = arith.addf %46, %48 : vector<8x64xf32>
    %50 = arith.negf %49 : vector<8x64xf32>
    %51 = math.exp %50 : vector<8x64xf32>
    %cst_17 = arith.constant 1.000000e+00 : f32
    %52 = vector.broadcast %cst_17 : f32 to vector<8x64xf32>
    %53 = arith.addf %52, %51 : vector<8x64xf32>
    %54 = arith.divf %52, %53 : vector<8x64xf32>
    %55 = math.tanh %49 : vector<8x64xf32>
    %56 = vector.extract_strided_slice %54 {offsets = [0, 0], sizes = [8, 16], strides = [1, 1]} : vector<8x64xf32> to vector<8x16xf32>
    %57 = vector.extract_strided_slice %54 {offsets = [0, 16], sizes = [8, 16], strides = [1, 1]} : vector<8x64xf32> to vector<8x16xf32>
    %58 = vector.extract_strided_slice %55 {offsets = [0, 32], sizes = [8, 16], strides = [1, 1]} : vector<8x64xf32> to vector<8x16xf32>
    %59 = vector.extract_strided_slice %54 {offsets = [0, 48], sizes = [8, 16], strides = [1, 1]} : vector<8x64xf32> to vector<8x16xf32>
    %60 = arith.mulf %57, %44 : vector<8x16xf32>
    %61 = arith.mulf %56, %58 : vector<8x16xf32>
    %62 = arith.addf %60, %61 : vector<8x16xf32>
    %63 = math.tanh %62 : vector<8x16xf32>
    %64 = arith.mulf %59, %63 : vector<8x16xf32>
    %65 = vector.extract_strided_slice %42 {offsets = [1, 0, 0], sizes = [1, 8, 64], strides = [1, 1, 1]} : vector<8x8x64xf32> to vector<1x8x64xf32>
    %66 = vector.shape_cast %65 : vector<1x8x64xf32> to vector<8x64xf32>
    %67 = arith.truncf %64 : vector<8x16xf32> to vector<8x16xbf16>
    %cst_18 = arith.constant dense<0.000000e+00> : vector<8x64xf32>
    %68 = tpu.matmul %67, %2, %cst_18 {dimension_numbers = #tpu.dot_dimension_numbers<[1], [0], [0], [1], [0, 0, 1, 1], [], []>} : vector<8x16xbf16>, vector<16x64xbf16>, vector<8x64xf32> -> vector<8x64xf32>
    %69 = arith.addf %66, %68 : vector<8x64xf32>
    %70 = arith.negf %69 : vector<8x64xf32>
    %71 = math.exp %70 : vector<8x64xf32>
    %cst_19 = arith.constant 1.000000e+00 : f32
    %72 = vector.broadcast %cst_19 : f32 to vector<8x64xf32>
    %73 = arith.addf %72, %71 : vector<8x64xf32>
    %74 = arith.divf %72, %73 : vector<8x64xf32>
    %75 = math.tanh %69 : vector<8x64xf32>
    %76 = vector.extract_strided_slice %74 {offsets = [0, 0], sizes = [8, 16], strides = [1, 1]} : vector<8x64xf32> to vector<8x16xf32>
    %77 = vector.extract_strided_slice %74 {offsets = [0, 16], sizes = [8, 16], strides = [1, 1]} : vector<8x64xf32> to vector<8x16xf32>
    %78 = vector.extract_strided_slice %75 {offsets = [0, 32], sizes = [8, 16], strides = [1, 1]} : vector<8x64xf32> to vector<8x16xf32>
    %79 = vector.extract_strided_slice %74 {offsets = [0, 48], sizes = [8, 16], strides = [1, 1]} : vector<8x64xf32> to vector<8x16xf32>
    %80 = arith.mulf %77, %62 : vector<8x16xf32>
    %81 = arith.mulf %76, %78 : vector<8x16xf32>
    %82 = arith.addf %80, %81 : vector<8x16xf32>
    %83 = math.tanh %82 : vector<8x16xf32>
    %84 = arith.mulf %79, %83 : vector<8x16xf32>
    %85 = vector.extract_strided_slice %42 {offsets = [2, 0, 0], sizes = [1, 8, 64], strides = [1, 1, 1]} : vector<8x8x64xf32> to vector<1x8x64xf32>
    %86 = vector.shape_cast %85 : vector<1x8x64xf32> to vector<8x64xf32>
    %87 = arith.truncf %84 : vector<8x16xf32> to vector<8x16xbf16>
    %cst_20 = arith.constant dense<0.000000e+00> : vector<8x64xf32>
    %88 = tpu.matmul %87, %2, %cst_20 {dimension_numbers = #tpu.dot_dimension_numbers<[1], [0], [0], [1], [0, 0, 1, 1], [], []>} : vector<8x16xbf16>, vector<16x64xbf16>, vector<8x64xf32> -> vector<8x64xf32>
    %89 = arith.addf %86, %88 : vector<8x64xf32>
    %90 = arith.negf %89 : vector<8x64xf32>
    %91 = math.exp %90 : vector<8x64xf32>
    %cst_21 = arith.constant 1.000000e+00 : f32
    %92 = vector.broadcast %cst_21 : f32 to vector<8x64xf32>
    %93 = arith.addf %92, %91 : vector<8x64xf32>
    %94 = arith.divf %92, %93 : vector<8x64xf32>
    %95 = math.tanh %89 : vector<8x64xf32>
    %96 = vector.extract_strided_slice %94 {offsets = [0, 0], sizes = [8, 16], strides = [1, 1]} : vector<8x64xf32> to vector<8x16xf32>
    %97 = vector.extract_strided_slice %94 {offsets = [0, 16], sizes = [8, 16], strides = [1, 1]} : vector<8x64xf32> to vector<8x16xf32>
    %98 = vector.extract_strided_slice %95 {offsets = [0, 32], sizes = [8, 16], strides = [1, 1]} : vector<8x64xf32> to vector<8x16xf32>
    %99 = vector.extract_strided_slice %94 {offsets = [0, 48], sizes = [8, 16], strides = [1, 1]} : vector<8x64xf32> to vector<8x16xf32>
    %100 = arith.mulf %97, %82 : vector<8x16xf32>
    %101 = arith.mulf %96, %98 : vector<8x16xf32>
    %102 = arith.addf %100, %101 : vector<8x16xf32>
    %103 = math.tanh %102 : vector<8x16xf32>
    %104 = arith.mulf %99, %103 : vector<8x16xf32>
    %105 = vector.extract_strided_slice %42 {offsets = [3, 0, 0], sizes = [1, 8, 64], strides = [1, 1, 1]} : vector<8x8x64xf32> to vector<1x8x64xf32>
    %106 = vector.shape_cast %105 : vector<1x8x64xf32> to vector<8x64xf32>
    %107 = arith.truncf %104 : vector<8x16xf32> to vector<8x16xbf16>
    %cst_22 = arith.constant dense<0.000000e+00> : vector<8x64xf32>
    %108 = tpu.matmul %107, %2, %cst_22 {dimension_numbers = #tpu.dot_dimension_numbers<[1], [0], [0], [1], [0, 0, 1, 1], [], []>} : vector<8x16xbf16>, vector<16x64xbf16>, vector<8x64xf32> -> vector<8x64xf32>
    %109 = arith.addf %106, %108 : vector<8x64xf32>
    %110 = arith.negf %109 : vector<8x64xf32>
    %111 = math.exp %110 : vector<8x64xf32>
    %cst_23 = arith.constant 1.000000e+00 : f32
    %112 = vector.broadcast %cst_23 : f32 to vector<8x64xf32>
    %113 = arith.addf %112, %111 : vector<8x64xf32>
    %114 = arith.divf %112, %113 : vector<8x64xf32>
    %115 = math.tanh %109 : vector<8x64xf32>
    %116 = vector.extract_strided_slice %114 {offsets = [0, 0], sizes = [8, 16], strides = [1, 1]} : vector<8x64xf32> to vector<8x16xf32>
    %117 = vector.extract_strided_slice %114 {offsets = [0, 16], sizes = [8, 16], strides = [1, 1]} : vector<8x64xf32> to vector<8x16xf32>
    %118 = vector.extract_strided_slice %115 {offsets = [0, 32], sizes = [8, 16], strides = [1, 1]} : vector<8x64xf32> to vector<8x16xf32>
    %119 = vector.extract_strided_slice %114 {offsets = [0, 48], sizes = [8, 16], strides = [1, 1]} : vector<8x64xf32> to vector<8x16xf32>
    %120 = arith.mulf %117, %102 : vector<8x16xf32>
    %121 = arith.mulf %116, %118 : vector<8x16xf32>
    %122 = arith.addf %120, %121 : vector<8x16xf32>
    %123 = math.tanh %122 : vector<8x16xf32>
    %124 = arith.mulf %119, %123 : vector<8x16xf32>
    %125 = vector.extract_strided_slice %42 {offsets = [4, 0, 0], sizes = [1, 8, 64], strides = [1, 1, 1]} : vector<8x8x64xf32> to vector<1x8x64xf32>
    %126 = vector.shape_cast %125 : vector<1x8x64xf32> to vector<8x64xf32>
    %127 = arith.truncf %124 : vector<8x16xf32> to vector<8x16xbf16>
    %cst_24 = arith.constant dense<0.000000e+00> : vector<8x64xf32>
    %128 = tpu.matmul %127, %2, %cst_24 {dimension_numbers = #tpu.dot_dimension_numbers<[1], [0], [0], [1], [0, 0, 1, 1], [], []>} : vector<8x16xbf16>, vector<16x64xbf16>, vector<8x64xf32> -> vector<8x64xf32>
    %129 = arith.addf %126, %128 : vector<8x64xf32>
    %130 = arith.negf %129 : vector<8x64xf32>
    %131 = math.exp %130 : vector<8x64xf32>
    %cst_25 = arith.constant 1.000000e+00 : f32
    %132 = vector.broadcast %cst_25 : f32 to vector<8x64xf32>
    %133 = arith.addf %132, %131 : vector<8x64xf32>
    %134 = arith.divf %132, %133 : vector<8x64xf32>
    %135 = math.tanh %129 : vector<8x64xf32>
    %136 = vector.extract_strided_slice %134 {offsets = [0, 0], sizes = [8, 16], strides = [1, 1]} : vector<8x64xf32> to vector<8x16xf32>
    %137 = vector.extract_strided_slice %134 {offsets = [0, 16], sizes = [8, 16], strides = [1, 1]} : vector<8x64xf32> to vector<8x16xf32>
    %138 = vector.extract_strided_slice %135 {offsets = [0, 32], sizes = [8, 16], strides = [1, 1]} : vector<8x64xf32> to vector<8x16xf32>
    %139 = vector.extract_strided_slice %134 {offsets = [0, 48], sizes = [8, 16], strides = [1, 1]} : vector<8x64xf32> to vector<8x16xf32>
    %140 = arith.mulf %137, %122 : vector<8x16xf32>
    %141 = arith.mulf %136, %138 : vector<8x16xf32>
    %142 = arith.addf %140, %141 : vector<8x16xf32>
    %143 = math.tanh %142 : vector<8x16xf32>
    %144 = arith.mulf %139, %143 : vector<8x16xf32>
    %145 = vector.extract_strided_slice %42 {offsets = [5, 0, 0], sizes = [1, 8, 64], strides = [1, 1, 1]} : vector<8x8x64xf32> to vector<1x8x64xf32>
    %146 = vector.shape_cast %145 : vector<1x8x64xf32> to vector<8x64xf32>
    %147 = arith.truncf %144 : vector<8x16xf32> to vector<8x16xbf16>
    %cst_26 = arith.constant dense<0.000000e+00> : vector<8x64xf32>
    %148 = tpu.matmul %147, %2, %cst_26 {dimension_numbers = #tpu.dot_dimension_numbers<[1], [0], [0], [1], [0, 0, 1, 1], [], []>} : vector<8x16xbf16>, vector<16x64xbf16>, vector<8x64xf32> -> vector<8x64xf32>
    %149 = arith.addf %146, %148 : vector<8x64xf32>
    %150 = arith.negf %149 : vector<8x64xf32>
    %151 = math.exp %150 : vector<8x64xf32>
    %cst_27 = arith.constant 1.000000e+00 : f32
    %152 = vector.broadcast %cst_27 : f32 to vector<8x64xf32>
    %153 = arith.addf %152, %151 : vector<8x64xf32>
    %154 = arith.divf %152, %153 : vector<8x64xf32>
    %155 = math.tanh %149 : vector<8x64xf32>
    %156 = vector.extract_strided_slice %154 {offsets = [0, 0], sizes = [8, 16], strides = [1, 1]} : vector<8x64xf32> to vector<8x16xf32>
    %157 = vector.extract_strided_slice %154 {offsets = [0, 16], sizes = [8, 16], strides = [1, 1]} : vector<8x64xf32> to vector<8x16xf32>
    %158 = vector.extract_strided_slice %155 {offsets = [0, 32], sizes = [8, 16], strides = [1, 1]} : vector<8x64xf32> to vector<8x16xf32>
    %159 = vector.extract_strided_slice %154 {offsets = [0, 48], sizes = [8, 16], strides = [1, 1]} : vector<8x64xf32> to vector<8x16xf32>
    %160 = arith.mulf %157, %142 : vector<8x16xf32>
    %161 = arith.mulf %156, %158 : vector<8x16xf32>
    %162 = arith.addf %160, %161 : vector<8x16xf32>
    %163 = math.tanh %162 : vector<8x16xf32>
    %164 = arith.mulf %159, %163 : vector<8x16xf32>
    %165 = vector.extract_strided_slice %42 {offsets = [6, 0, 0], sizes = [1, 8, 64], strides = [1, 1, 1]} : vector<8x8x64xf32> to vector<1x8x64xf32>
    %166 = vector.shape_cast %165 : vector<1x8x64xf32> to vector<8x64xf32>
    %167 = arith.truncf %164 : vector<8x16xf32> to vector<8x16xbf16>
    %cst_28 = arith.constant dense<0.000000e+00> : vector<8x64xf32>
    %168 = tpu.matmul %167, %2, %cst_28 {dimension_numbers = #tpu.dot_dimension_numbers<[1], [0], [0], [1], [0, 0, 1, 1], [], []>} : vector<8x16xbf16>, vector<16x64xbf16>, vector<8x64xf32> -> vector<8x64xf32>
    %169 = arith.addf %166, %168 : vector<8x64xf32>
    %170 = arith.negf %169 : vector<8x64xf32>
    %171 = math.exp %170 : vector<8x64xf32>
    %cst_29 = arith.constant 1.000000e+00 : f32
    %172 = vector.broadcast %cst_29 : f32 to vector<8x64xf32>
    %173 = arith.addf %172, %171 : vector<8x64xf32>
    %174 = arith.divf %172, %173 : vector<8x64xf32>
    %175 = math.tanh %169 : vector<8x64xf32>
    %176 = vector.extract_strided_slice %174 {offsets = [0, 0], sizes = [8, 16], strides = [1, 1]} : vector<8x64xf32> to vector<8x16xf32>
    %177 = vector.extract_strided_slice %174 {offsets = [0, 16], sizes = [8, 16], strides = [1, 1]} : vector<8x64xf32> to vector<8x16xf32>
    %178 = vector.extract_strided_slice %175 {offsets = [0, 32], sizes = [8, 16], strides = [1, 1]} : vector<8x64xf32> to vector<8x16xf32>
    %179 = vector.extract_strided_slice %174 {offsets = [0, 48], sizes = [8, 16], strides = [1, 1]} : vector<8x64xf32> to vector<8x16xf32>
    %180 = arith.mulf %177, %162 : vector<8x16xf32>
    %181 = arith.mulf %176, %178 : vector<8x16xf32>
    %182 = arith.addf %180, %181 : vector<8x16xf32>
    %183 = math.tanh %182 : vector<8x16xf32>
    %184 = arith.mulf %179, %183 : vector<8x16xf32>
    %185 = vector.extract_strided_slice %42 {offsets = [7, 0, 0], sizes = [1, 8, 64], strides = [1, 1, 1]} : vector<8x8x64xf32> to vector<1x8x64xf32>
    %186 = vector.shape_cast %185 : vector<1x8x64xf32> to vector<8x64xf32>
    %187 = arith.truncf %184 : vector<8x16xf32> to vector<8x16xbf16>
    %cst_30 = arith.constant dense<0.000000e+00> : vector<8x64xf32>
    %188 = tpu.matmul %187, %2, %cst_30 {dimension_numbers = #tpu.dot_dimension_numbers<[1], [0], [0], [1], [0, 0, 1, 1], [], []>} : vector<8x16xbf16>, vector<16x64xbf16>, vector<8x64xf32> -> vector<8x64xf32>
    %189 = arith.addf %186, %188 : vector<8x64xf32>
    %190 = arith.negf %189 : vector<8x64xf32>
    %191 = math.exp %190 : vector<8x64xf32>
    %cst_31 = arith.constant 1.000000e+00 : f32
    %192 = vector.broadcast %cst_31 : f32 to vector<8x64xf32>
    %193 = arith.addf %192, %191 : vector<8x64xf32>
    %194 = arith.divf %192, %193 : vector<8x64xf32>
    %195 = math.tanh %189 : vector<8x64xf32>
    %196 = vector.extract_strided_slice %194 {offsets = [0, 0], sizes = [8, 16], strides = [1, 1]} : vector<8x64xf32> to vector<8x16xf32>
    %197 = vector.extract_strided_slice %194 {offsets = [0, 16], sizes = [8, 16], strides = [1, 1]} : vector<8x64xf32> to vector<8x16xf32>
    %198 = vector.extract_strided_slice %195 {offsets = [0, 32], sizes = [8, 16], strides = [1, 1]} : vector<8x64xf32> to vector<8x16xf32>
    %199 = vector.extract_strided_slice %194 {offsets = [0, 48], sizes = [8, 16], strides = [1, 1]} : vector<8x64xf32> to vector<8x16xf32>
    %200 = arith.mulf %197, %182 : vector<8x16xf32>
    %201 = arith.mulf %196, %198 : vector<8x16xf32>
    %202 = arith.addf %200, %201 : vector<8x16xf32>
    %203 = math.tanh %202 : vector<8x16xf32>
    %204 = arith.mulf %199, %203 : vector<8x16xf32>
    %cst_32 = arith.constant dense<0.000000e+00> : vector<8x7xf32>
    %205 = tpu.matmul %204, %4, %cst_32 {dimension_numbers = #tpu.dot_dimension_numbers<[1], [0], [0], [1], [0, 0, 1, 1], [], []>} : vector<8x16xf32>, vector<16x7xf32>, vector<8x7xf32> -> vector<8x7xf32>
    %206 = vector.broadcast %5 : vector<1x7xf32> to vector<8x7xf32>
    %207 = arith.addf %205, %206 : vector<8x7xf32>
    %c0_33 = arith.constant 0 : index
    %c0_34 = arith.constant 0 : index
    %208 = vector.load %arg4[%c0_33, %c0_34] : memref<8x7xf32, #tpu.memory_space<vmem>>, vector<8x7xf32>
    tpu.vector_store %arg4[%c0_33, %c0_34], %207 {strides = array<i32>} : memref<8x7xf32, #tpu.memory_space<vmem>>, vector<8x7xf32>,
    return
  }
}

</mosaic_0001>

<bundles_post_ra>
// kernel: module_lstm_forward.1
= control target key start
LH: loop header
LB: loop body
LE: loop exit
PB: predicated region body
PF: predicated region fallthrough
CT: control target
= control target key end

     0   :  { %vm76_vm0 = vcmask 1042432   ;;  %vm77_vm1 = vcmask 1043456   ;;  %vm63_vm2 = vcmask 56320   ;;  %v3647_v4 = vmov 65535   ;;  %s4708_s0 = inlined_call_operand.vmem [shape: f32[8,8,38], index: 0, kind: input, shape index: {}]   ;;  %s4709_s1 = inlined_call_operand.vmem [shape: f32[8,8,7], index: 1, kind: input, shape index: {}]   ;;  %s4710_s2 = inlined_call_operand.vmem [shape: bf16[61,64], index: 2, kind: input, shape index: {}]   ;;  %s4711_s3 = inlined_call_operand.vmem [shape: f32[18,64], index: 3, kind: input, shape index: {}]   ;;  %s4712_s4 = inlined_call_operand.hbm [shape: f32[8,7], index: 4, kind: output, shape index: {}]  }
   0x1   :  { %v3105_v0 = vld [vmem:[%s4710_s2 + $0x10] sm:$0x78]   ;;  %v45_v1 = vld [vmem:[%s4709_s1] sm:$0xff]  ;;  %v46_v2 = vld [vmem:[%s4709_s1 + $0x8] sm:$0xff]  ;;  %v78_v5 = vsel %vm76_vm0, 4294967295, %v3647_v4  ;;  %v3648_v14 = vmov 0.0  }
   0x2   :  { %v62_v3 = vrot.slane %v3105_v0, 3  ;;  %v53_v6 = vpack.c.bf16 %v46_v2, %v45_v1  ;;  %v47_v7 = vld [vmem:[%s4709_s1 + $0x10] sm:$0xff]  ;;  %v79_v8 = vsel %vm77_vm1, %v78_v5, 0  ;;  %v48_v9 = vld [vmem:[%s4709_s1 + $0x18] sm:$0xff]  ;;  %v3106_v11 = vld [vmem:[%s4710_s2] sm:$0xff]   ;;  %3028 = vmatprep.subr.bf16.mxu1 %v3648_v14  ;;  %vm3649_vm3 = vmmov 0  }
   0x3   :  { %v49_v12 = vld [vmem:[%s4709_s1 + $0x20] sm:$0xff]  ;;  %v50_v13 = vld [vmem:[%s4709_s1 + $0x28] sm:$0xff]  ;;  %v54_v15 = vpack.c.bf16 %v48_v9, %v47_v7  ;;  %3030 = vmatprep.mubr.msk.bf16.mxu1 %vm3649_vm3, %v3648_v14  ;;  %v3109_v18 = vld [vmem:[%s4710_s2 + $0x14] sm:$0xfc]  }
   0x4   :  { %v81_v10 = vand.u32 %v79_v8, %v62_v3  ;;  %3006 = vmatprep.mubr.msk.bf16.mxu0 %vm63_vm2, %v53_v6  ;;  %v55_v16 = vpack.c.bf16 %v50_v13, %v49_v12  ;;  %v3107_v17 = vld [vmem:[%s4710_s2 + $0x8] sm:$0xff]   ;;  %v3110_v19 = vld [vmem:[%s4710_s2 + $0x1c] ss:$0 sps:$4 sm:$0x77]   ;;  %v51_v20 = vld [vmem:[%s4709_s1 + $0x30] sm:$0xff]  ;;  %v386_v22 = vshrl.u32 %v3109_v18, 16 }
   0x5   :  { %v52_v21 = vld [vmem:[%s4709_s1 + $0x38] sm:$0xff]  ;;  %v389_v23 = vshll.u32 %v3109_v18, 16  ;;  %v394_v24 = vshrl.u32 %v3110_v19, 16  ;;  %v397_v25 = vshll.u32 %v3110_v19, 16  ;;  %v33_v27 = vld [vmem:[%s4708_s0] sm:$0xff]  ;;  %v34_v28 = vld [vmem:[%s4708_s0 + $0x8] sm:$0xff] }
   0x6   :  { %3004 = vmatprep.subr.bf16.mxu0 %v81_v10  ;;  %v3108_v26 = vld [vmem:[%s4710_s2 + $0x10] ss:$0 sps:$4 sm:$0x77]   ;;  %v388_v29 = vrot.slane %v386_v22, 2 }
   0x7   :  { %3005 = vmatpush3.bf16.msra.mxu0 %v81_v10  ;;  %v391_v30 = vrot.slane %v389_v23, 3  ;;  %v396_v31 = vrot.slane %v394_v24, 2  ;;  %v399_v32 = vrot.slane %v397_v25, 3 }
   0x8   :  { %3014 = vmatprep.subr.bf16.mxu0 %v3106_v11 }
   0xa   :  { %3007 = vmatmul.mubr.msk.bf16.vlgmr.msra.gmra.mrb[0].mxu0 %vm63_vm2, %v54_v15 }
   0xb   :  { %3015 = vmatpush3.bf16.msra.mxu0 %v3106_v11  ;;  %3010 = vmatprep.mubr.msk.bf16.mxu0 %vm63_vm2, %v55_v16 }
   0xc   :  { %3016 = vmatprep.subr.bf16.mxu0 %v3107_v17 }
   0xd   :  { %9 = vsyncpa [#allocation3], 0  ;;  %vm384_vm4 = vsmask.f32 5376  ;;  %v56_v33 = vpack.c.bf16 %v52_v21, %v51_v20  ;;  %v392_v34 = vor.u32 %v391_v30, %v388_v29  ;;  %v400_v35 = vor.u32 %v399_v32, %v396_v31  ;;  %v35_v39 = vld [vmem:[%s4708_s0 + $0x10] sm:$0xff]  ;;  %v36_v40 = vld [vmem:[%s4708_s0 + $0x18] sm:$0xff] }
   0xe   :  { %v41_v36 = vpack.c.bf16 %v34_v28, %v33_v27  ;;  %v177_v37 = vsel %vm76_vm0, %v3108_v26, 0  ;;  %vm163_vm5 = vcmask 310272   ;;  %v3650_v41 = vmov 0   ;;  %v37_v42 = vld [vmem:[%s4708_s0 + $0x20] sm:$0xff]  ;;  %v38_v43 = vld [vmem:[%s4708_s0 + $0x28] sm:$0xff]  ;;  %v39_v46 = vld [vmem:[%s4708_s0 + $0x30] sm:$0xff] }
   0xf   :  { %3017 = vmatpush3.bf16.msra.mxu0 %v3107_v17  ;;  %v3739_v38 = vsel %vm384_vm4, %v392_v34, %v400_v35  ;;  %v42_v44 = vpack.c.bf16 %v36_v40, %v35_v39  ;;  %v43_v45 = vpack.c.bf16 %v38_v43, %v37_v42  ;;  %v40_v47 = vld [vmem:[%s4708_s0 + $0x38] sm:$0xff]  ;;  %v2897_v53 = vld [vmem:[%s4711_s3] ss:$0 sm:$0xff]  ;;  %s3651_s0 = smov 96   ;;  %s3652_s7 = smov 16   ;;  %vm688_vm6 = vcmask 1041409  }
  0x10   :  { %3094 = vmatprep.subr.msk.bf16.mxu0 %vm76_vm0, %v3108_v26  ;;  %3029 = vmatpush3.bf16.msra.mxu1 %v3739_v38  ;;  %v44_v48 = vpack.c.bf16 %v40_v47, %v39_v46  ;;  %s3653_s8 = smov 32   ;;  %vm691_vm7 = vcmask 1042434   ;;  %vm694_vm8 = vcmask 1043459   ;;  %vm697_vm9 = vcmask 1044484   ;;  %s3654_s9 = smov 80  }
  0x11   :  { %3034 = vmatprep.subr.bf16.mxu1 %v3648_v14  ;;  %vm700_vm10 = vcmask 1045509   ;;  %vm703_vm11 = vcmask 1046534   ;;  %vm706_vm12 = vcmask 1047559   ;;  %vm403_vm13 = vcmask 130048   ;;  %s3656_s16 = smov [#allocation2]  }
  0x12   :  { %3011 = vmatmul.mubr.msk.bf16.gmra.mrb[4].mxu0 %vm63_vm2, %v56_v33  ;;  %s2877_s17 = sshll.u32 %s3656_s16, 4  ;;  %s2878_s17 = int_to_ptr.vmem [resolvable:$true] %s2877_s17 }
  0x13   :  { %3019 = vmatpush3.bf16.msra.mxu0 %v177_v37  ;;  %3020 = vmatprep.mubr.msk.bf16.mxu0 %vm163_vm5, %v41_v36  ;;  %s3623_s18 = scalar_lea.vmem %s2878_s17, 128  ;;  %p3628_p1 = scmp.lt.s32.totalorder %s2878_s17, %s2878_s17 }
  0x14   :  { %3031 = vmatmul.mubr.bf16.vlgmr.msra.gmra.mrb[0].mxu1 %v3650_v41  ;;  %3052 = vmatprep.subr.bf16.mxu0 %v3648_v14  ;;  %p3624_p0 = scmp.ne.s32.totalorder %s2878_s17, %s3623_s18  ;;  %p3629_p2 = scmp.lt.s32.totalorder %s3623_s18, %s3623_s18 }
  0x15   :  { %3035 = vmatpush3.bf16.msra.mxu1 %v3739_v38  ;;  %3036 = vmatprep.mubr.msk.bf16.mxu1 %vm3649_vm3, %v3648_v14 }
  0x16   :  { %3040 = vmatprep.subr.bf16.mxu1 %v3648_v14  ;;  %p3630_p3 = por %p3629_p2, %p3628_p1 }
  0x18   :  { %p3631_p4 = pnand %p3630_p3, %p3624_p0 }
  0x1a   :  { %3021 = vmatmul.mubr.msk.bf16.vlgmr.msra.gmra.mrb[0].mxu0 %vm163_vm5, %v42_v44 }
  0x1b   :  { %3024 = vmatprep.mubr.msk.bf16.mxu0 %vm163_vm5, %v43_v45  ;;  %3053 = vmatpush3.bf16.msra.mxu0 %v3739_v38 }
  0x1c   :  { %3064 = vmatprep.subr.bf16.mxu0 %v3648_v14 }
  0x22   :  { %3025 = vmatmul.mubr.msk.bf16.gmra.mrb[4].mxu0 %vm163_vm5, %v44_v48 }
  0x23   :  { %3054 = vmatprep.mubr.msk.bf16.mxu0 %vm3649_vm3, %v3648_v14 }
  0xe7   :  { %v441_v49 = vpop.f32.mrb[0].mxu1 }
  0xe8   :  { %v3032_v50 = vpop.f32.mrb[1].mxu1  ;;  %v449_v54 = vrot.slane %v441_v49, 2  ;;  %v450_v57 = vrot.slane %v441_v49, 3  ;;  %v448_v59 = vrot.slane %v441_v49, 1  ;;  %v453_v6 = vrot.slane %v441_v49, 6 }
  0xe9   :  { %v444_v51 = vpop.f32.mrb[2].mxu1  ;;  %v451_v9 = vrot.slane %v441_v49, 4  ;;  %v454_v12 = vrot.slane %v441_v49, 7  ;;  %v452_v17 = vrot.slane %v441_v49, 5 }
  0xea   :  { %v3033_v52 = vpop.f32.mrb[3].mxu1 }
  0xed   :  { %v3022_v55 = vpop.f32.mrb[0].mxu0 }
  0xee   :  { %v3778_v56 = vadd.f32 %v3022_v55, %v2897_v53  ;;  %v213_v58 = vpop.f32.mrb[1].mxu0 }
  0xef   :  { %v3780_v60 = vadd.f32 %v2897_v53, %v213_v58  ;;  %v3023_v61 = vpop.f32.mrb[2].mxu0 }
  0xf0   :  { %v3782_v62 = vadd.f32 %v3023_v61, %v2897_v53  ;;  %v216_v63 = vpop.f32.mrb[3].mxu0  ;;  %v465_v0 = vadd.f32 %v449_v54, %v3778_v56 }
  0xf1   :  { %v3785_v1 = vadd.f32 %v2897_v53, %v216_v63  ;;  %v463_v2 = vadd.f32 %v441_v49, %v3780_v60 }
  0xf2   :  { %3111 = vtanh.f32 %v465_v0  ;;  %v466_v3 = vadd.f32 %v450_v57, %v3782_v62  ;;  %v2902_v30 = vmul.f32 -1.442695, %v465_v0 }
  0xf3   :  { %3113 = vtanh.f32 %v463_v2  ;;  %v464_v4 = vadd.f32 %v448_v59, %v3785_v1  ;;  %v2900_v31 = vmul.f32 -1.442695, %v463_v2 }
  0xf4   :  { %v2903_v33 = vmul.f32 -1.442695, %v466_v3 }
  0xf5   :  { %v3026_v5 = vpop.f32.mrb[4].mxu0  ;;  %3115 = vtanh.f32 %v464_v4  ;;  %v2901_v32 = vmul.f32 -1.442695, %v464_v4 }
  0xf6   :  { %v3790_v7 = vadd.f32 %v3026_v5, %v2897_v53  ;;  %v229_v8 = vpop.f32.mrb[5].mxu0  ;;  %3117 = vtanh.f32 %v466_v3 }
  0xf7   :  { %v3792_v10 = vadd.f32 %v2897_v53, %v229_v8  ;;  %v3027_v11 = vpop.f32.mrb[6].mxu0 }
  0xf8   :  { %v3794_v13 = vadd.f32 %v3027_v11, %v2897_v53  ;;  %v232_v15 = vpop.f32.mrb[7].mxu0  ;;  %v469_v16 = vadd.f32 %v453_v6, %v3790_v7 }
  0xf9   :  { %v3797_v18 = vadd.f32 %v2897_v53, %v232_v15  ;;  %v467_v19 = vadd.f32 %v451_v9, %v3792_v10 }
  0xfa   :  { %v470_v20 = vadd.f32 %v454_v12, %v3794_v13  ;;  %v2906_v36 = vmul.f32 -1.442695, %v469_v16 }
  0xfb   :  { %3119 = vtanh.f32 %v467_v19  ;;  %v468_v21 = vadd.f32 %v452_v17, %v3797_v18  ;;  %v2904_v34 = vmul.f32 -1.442695, %v467_v19 }
  0xfc   :  { %v3112_v22 = vpop.eup %3111  ;;  %v2907_v40 = vmul.f32 -1.442695, %v470_v20 }
  0xfd   :  { %v3114_v23 = vpop.eup %3113  ;;  %547 = vrot.lane.b32.xlu0 %v3112_v22, %s3651_s0  ;;  %3121 = vtanh.f32 %v468_v21  ;;  %v2905_v35 = vmul.f32 -1.442695, %v468_v21 }
  0xfe   :  { %543 = vrot.lane.b32.xlu1 %v3114_v23, %s3651_s0  ;;  %3123 = vtanh.f32 %v469_v16 }
  0xff   :  { %v3116_v24 = vpop.eup %3115  ;;  %3125 = vtanh.f32 %v470_v20 }
 0x100   :  { %v3118_v25 = vpop.eup %3117  ;;  %3127 = vpow2.f32 %v2902_v30 }
 0x101   :  { %545 = vrot.lane.b32.xlu0 %v3116_v24, %s3651_s0  ;;  %3129 = vpow2.f32 %v2900_v31 }
 0x102   :  { %549 = vrot.lane.b32.xlu1 %v3118_v25, %s3651_s0  ;;  %3131 = vpow2.f32 %v2901_v32 }
 0x103   :  { %3133 = vpow2.f32 %v2903_v33 }
 0x104   :  { %3135 = vpow2.f32 %v2904_v34 }
 0x105   :  { %v3120_v26 = vpop.eup %3119  ;;  %3137 = vpow2.f32 %v2905_v35 }
 0x106   :  { %551 = vrot.lane.b32.xlu0 %v3120_v26, %s3651_s0  ;;  %3139 = vpow2.f32 %v2906_v36 }
 0x107   :  { %v3122_v27 = vpop.eup %3121  ;;  %3141 = vpow2.f32 %v2907_v40 }
 0x108   :  { %v3124_v28 = vpop.eup %3123  ;;  %553 = vrot.lane.b32.xlu1 %v3122_v27, %s3651_s0 }
 0x109   :  { %v3126_v29 = vpop.eup %3125 }
 0x10a   :  { %555 = vrot.lane.b32.xlu0 %v3124_v28, %s3651_s0  ;;  %v3128_v37 = vpop.eup %3127 }
 0x10b   :  { %v3130_v39 = vpop.eup %3129  ;;  %v497_v41 = vadd.f32 1.0, %v3128_v37 }
 0x10c   :  { %557 = vrot.lane.b32.xlu1 %v3126_v29, %s3651_s0  ;;  %v3132_v42 = vpop.eup %3131  ;;  %v495_v43 = vadd.f32 1.0, %v3130_v39 }
 0x10d   :  { %v3134_v44 = vpop.eup %3133  ;;  %3143 = vrcp.f32 %v497_v41  ;;  %v496_v45 = vadd.f32 1.0, %v3132_v42 }
 0x10e   :  { %3145 = vrcp.f32 %v495_v43  ;;  %v3136_v46 = vpop.eup %3135  ;;  %v498_v47 = vadd.f32 1.0, %v3134_v44 }
 0x10f   :  { %3147 = vrcp.f32 %v496_v45  ;;  %v3138_v48 = vpop.eup %3137  ;;  %v499_v49 = vadd.f32 1.0, %v3136_v46 }
 0x110   :  { %v3140_v50 = vpop.eup %3139  ;;  %3149 = vrcp.f32 %v498_v47  ;;  %v500_v51 = vadd.f32 1.0, %v3138_v48 }
 0x111   :  { %v3142_v52 = vpop.eup %3141  ;;  %3151 = vrcp.f32 %v499_v49  ;;  %v501_v53 = vadd.f32 1.0, %v3140_v50 }
 0x112   :  { %3153 = vrcp.f32 %v500_v51  ;;  %v502_v63 = vadd.f32 1.0, %v3142_v52 }
 0x113   :  { %3155 = vrcp.f32 %v501_v53 }
 0x114   :  { %3157 = vrcp.f32 %v502_v63 }
 0x117   :  { %v3810_v54 = vpop.eup %3143 }
 0x118   :  { %v3812_v57 = vpop.eup %3145  ;;  %v529_v24 = vmul.f32 0.0, %v3810_v54 }
 0x119   :  { %v3817_v0 = vpop.eup %3147  ;;  %v527_v26 = vmul.f32 0.0, %v3812_v57 }
 0x11a   :  { %v3821_v4 = vpop.eup %3149  ;;  %v528_v30 = vmul.f32 0.0, %v3817_v0 }
 0x11b   :  { %v3825_v8 = vpop.eup %3151  ;;  %v530_v32 = vmul.f32 0.0, %v3821_v4 }
 0x11c   :  { %v3829_v12 = vpop.eup %3153  ;;  %v531_v36 = vmul.f32 0.0, %v3825_v8 }
 0x11d   :  { %v3832_v16 = vpop.eup %3155  ;;  %v532_v40 = vmul.f32 0.0, %v3829_v12 }
 0x11e   :  { %v3838_v21 = vpop.eup %3157  ;;  %v533_v42 = vmul.f32 0.0, %v3832_v16 }
 0x11f   :  { %v534_v48 = vmul.f32 0.0, %v3838_v21 }
 0x16f   :  { %v548_v55 = vpop.permute.xlu0 %547 }
 0x170   :  { %v569_v58 = vmul.f32 %v3810_v54, %v548_v55  ;;  %v544_v59 = vpop.permute.xlu1 %543 }
 0x171   :  { %v567_v61 = vmul.f32 %v3812_v57, %v544_v59 }
 0x172   :  { %587 = vrot.lane.b32.xlu1 %v569_v58, %s3652_s7 }
 0x173   :  { %v546_v2 = vpop.permute.xlu0 %545  ;;  %583 = vrot.lane.b32.xlu0 %v567_v61, %s3652_s7 }
 0x174   :  { %v568_v3 = vmul.f32 %v3817_v0, %v546_v2  ;;  %v550_v5 = vpop.permute.xlu1 %549 }
 0x175   :  { %v570_v6 = vmul.f32 %v3821_v4, %v550_v5 }
 0x177   :  { %585 = vrot.lane.b32.xlu0 %v568_v3, %s3652_s7  ;;  %589 = vrot.lane.b32.xlu1 %v570_v6, %s3652_s7 }
 0x178   :  { %v552_v9 = vpop.permute.xlu0 %551 }
 0x179   :  { %v571_v11 = vmul.f32 %v3825_v8, %v552_v9 }
 0x17a   :  { %v554_v15 = vpop.permute.xlu1 %553 }
 0x17b   :  { %591 = vrot.lane.b32.xlu0 %v571_v11, %s3652_s7  ;;  %v572_v17 = vmul.f32 %v3829_v12, %v554_v15 }
 0x17c   :  { %v556_v19 = vpop.permute.xlu0 %555 }
 0x17d   :  { %v573_v20 = vmul.f32 %v3832_v16, %v556_v19  ;;  %593 = vrot.lane.b32.xlu1 %v572_v17, %s3652_s7 }
 0x17e   :  { %v558_v22 = vpop.permute.xlu1 %557 }
 0x17f   :  { %595 = vrot.lane.b32.xlu0 %v573_v20, %s3652_s7  ;;  %v574_v23 = vmul.f32 %v3838_v21, %v558_v22 }
 0x181   :  { %597 = vrot.lane.b32.xlu1 %v574_v23, %s3652_s7 }
 0x1e4   :  { %v588_v25 = vpop.permute.xlu1 %587 }
 0x1e5   :  { %v3844_v27 = vadd.f32 %v588_v25, %v529_v24  ;;  %v584_v28 = vpop.permute.xlu0 %583 }
 0x1e6   :  { %v3846_v29 = vadd.f32 %v584_v28, %v527_v26 }
 0x1e7   :  { %3159 = vtanh.f32 %v3844_v27 }
 0x1e8   :  { %3161 = vtanh.f32 %v3846_v29 }
 0x1e9   :  { %v586_v31 = vpop.permute.xlu0 %585  ;;  %v590_v34 = vpop.permute.xlu1 %589 }
 0x1ea   :  { %v3852_v33 = vadd.f32 %v586_v31, %v528_v30  ;;  %v3854_v35 = vadd.f32 %v590_v34, %v530_v32 }
 0x1ec   :  { %3163 = vtanh.f32 %v3852_v33 }
 0x1ed   :  { %3165 = vtanh.f32 %v3854_v35  ;;  %v592_v37 = vpop.permute.xlu0 %591 }
 0x1ee   :  { %v3859_v39 = vadd.f32 %v592_v37, %v531_v36 }
 0x1ef   :  { %v594_v41 = vpop.permute.xlu1 %593 }
 0x1f0   :  { %3167 = vtanh.f32 %v3859_v39  ;;  %v3864_v44 = vadd.f32 %v594_v41, %v532_v40 }
 0x1f1   :  { %v3160_v43 = vpop.eup %3159  ;;  %v596_v45 = vpop.permute.xlu0 %595 }
 0x1f2   :  { %v3162_v46 = vpop.eup %3161  ;;  %v3866_v47 = vadd.f32 %v596_v45, %v533_v42  ;;  %635 = vrot.lane.b32.xlu1 %v3160_v43, %s3653_s8  ;;  %3169 = vtanh.f32 %v3864_v44 }
 0x1f3   :  { %631 = vrot.lane.b32.xlu0 %v3162_v46, %s3653_s8  ;;  %v598_v49 = vpop.permute.xlu1 %597 }
 0x1f4   :  { %3171 = vtanh.f32 %v3866_v47  ;;  %v3873_v51 = vadd.f32 %v598_v49, %v534_v48 }
 0x1f6   :  { %v3164_v50 = vpop.eup %3163  ;;  %3173 = vtanh.f32 %v3873_v51 }
 0x1f7   :  { %v3166_v52 = vpop.eup %3165  ;;  %633 = vrot.lane.b32.xlu0 %v3164_v50, %s3653_s8 }
 0x1f8   :  { %637 = vrot.lane.b32.xlu1 %v3166_v52, %s3653_s8 }
 0x1fa   :  { %v3168_v53 = vpop.eup %3167 }
 0x1fb   :  { %639 = vrot.lane.b32.xlu0 %v3168_v53, %s3653_s8 }
 0x1fc   :  { %v3170_v55 = vpop.eup %3169 }
 0x1fd   :  { %641 = vrot.lane.b32.xlu1 %v3170_v55, %s3653_s8 }
 0x1fe   :  { %v3172_v58 = vpop.eup %3171 }
 0x1ff   :  { %643 = vrot.lane.b32.xlu0 %v3172_v58, %s3653_s8 }
 0x200   :  { %v3174_v59 = vpop.eup %3173 }
 0x201   :  { %645 = vrot.lane.b32.xlu1 %v3174_v59, %s3653_s8 }
 0x264   :  { %v636_v61 = vpop.permute.xlu1 %635 }
 0x265   :  { %v657_v63 = vmul.f32 %v3810_v54, %v636_v61  ;;  %v632_v2 = vpop.permute.xlu0 %631 }
 0x266   :  { %v655_v3 = vmul.f32 %v3812_v57, %v632_v2 }
 0x267   :  { %v665_v5 = vpack.c.bf16 %v657_v63, %v657_v63 }
 0x268   :  { %v663_v17 = vpack.c.bf16 %v655_v3, %v655_v3  ;;  %v265_v3 = vrot.slane %v3785_v1, 1 }
 0x269   :  { %v634_v6 = vpop.permute.xlu0 %633  ;;  %v681_v20 = vunpack.c.l.b16 %v665_v5  ;;  %v266_v5 = vrot.slane %v3778_v56, 1 }
 0x26a   :  { %v656_v9 = vmul.f32 %v3817_v0, %v634_v6  ;;  %v638_v11 = vpop.permute.xlu1 %637  ;;  %v679_v26 = vunpack.c.l.b16 %v663_v17  ;;  %v267_v6 = vrot.slane %v3782_v62, 1  ;;  %v271_v17 = vrot.slane %v3794_v13, 1 }
 0x26b   :  { %v658_v15 = vmul.f32 %v3821_v4, %v638_v11  ;;  %v690_v31 = vrot.slane %v681_v20, 6  ;;  %v269_v11 = vrot.slane %v3797_v18, 1 }
 0x26c   :  { %v664_v19 = vpack.c.bf16 %v656_v9, %v656_v9  ;;  %v268_v9 = vrot.slane %v3792_v10, 1 }
 0x26d   :  { %v666_v22 = vpack.c.bf16 %v658_v15, %v658_v15  ;;  %v640_v23 = vpop.permute.xlu0 %639  ;;  %v270_v15 = vrot.slane %v3790_v7, 1 }
 0x26e   :  { %v680_v24 = vunpack.c.l.b16 %v664_v19  ;;  %v659_v25 = vmul.f32 %v3825_v8, %v640_v23 }
 0x26f   :  { %v682_v54 = vunpack.c.l.b16 %v666_v22  ;;  %v642_v30 = vpop.permute.xlu1 %641 }
 0x270   :  { %v687_v28 = vrot.slane %v680_v24, 7  ;;  %v667_v57 = vpack.c.bf16 %v659_v25, %v659_v25  ;;  %v660_v0 = vmul.f32 %v3829_v12, %v642_v30 }
 0x271   :  { %v644_v4 = vpop.permute.xlu0 %643  ;;  %v693_v34 = vrot.slane %v682_v54, 5 }
 0x272   :  { %v689_v32 = vsel %vm688_vm6, %v687_v28, %v679_v26  ;;  %v683_v36 = vunpack.c.l.b16 %v667_v57  ;;  %v661_v37 = vmul.f32 %v3832_v16, %v644_v4  ;;  %v668_v40 = vpack.c.bf16 %v660_v0, %v660_v0 }
 0x273   :  { %v692_v8 = vsel %vm691_vm7, %v690_v31, %v689_v32  ;;  %v646_v46 = vpop.permute.xlu1 %645 }
 0x274   :  { %v695_v41 = vsel %vm694_vm8, %v693_v34, %v692_v8  ;;  %v696_v42 = vrot.slane %v683_v36, 4  ;;  %v669_v43 = vpack.c.bf16 %v661_v37, %v661_v37  ;;  %v684_v45 = vunpack.c.l.b16 %v668_v40 }
 0x275   :  { %v662_v49 = vmul.f32 %v3838_v21, %v646_v46  ;;  %v264_v21 = vrot.slane %v3780_v60, 1 }
 0x276   :  { %v698_v48 = vsel %vm697_vm9, %v696_v42, %v695_v41  ;;  %v685_v12 = vunpack.c.l.b16 %v669_v43  ;;  %v699_v50 = vrot.slane %v684_v45, 3 }
 0x277   :  { %v670_v53 = vpack.c.bf16 %v662_v49, %v662_v49 }
 0x278   :  { %v702_v52 = vrot.slane %v685_v12, 2  ;;  %v701_v16 = vsel %vm700_vm10, %v699_v50, %v698_v48 }
 0x279   :  { %v686_v55 = vunpack.c.l.b16 %v670_v53 }
 0x27a   :  { %v704_v58 = vsel %vm703_vm11, %v702_v52, %v701_v16 }
 0x27b   :  { %v705_v59 = vrot.slane %v686_v55, 1 }
 0x27d   :  { %v707_v61 = vsel %vm706_vm12, %v705_v59, %v704_v58 }
 0x27e   :  { %v708_v63 = vpack.c.b16 %v707_v61, %v707_v61 }
 0x280   :  { %709 = vrot.lane.b32.xlu0 %v708_v63, %s3654_s9 }
 0x2f2   :  { %v710_v2 = vpop.permute.xlu0 %709 }
 0x2f3   :  { %3037 = vmatmul.mubr.msk.bf16.vlgmr.msra.gmra.mrb[4].mxu1 %vm403_vm13, %v710_v2 }
 0x2f4   :  { %3041 = vmatpush3.bf16.msra.mxu1 %v3739_v38  ;;  %3042 = vmatprep.mubr.msk.bf16.mxu1 %vm3649_vm3, %v3648_v14 }
 0x2f5   :  { %3046 = vmatprep.subr.bf16.mxu1 %v3648_v14 }
 0x3c6   :  { %v748_v19 = vpop.f32.mrb[4].mxu1 }
 0x3c7   :  { %v755_v20 = vrot.slane %v748_v19, 1  ;;  %v756_v22 = vrot.slane %v748_v19, 2  ;;  %v757_v23 = vrot.slane %v748_v19, 3  ;;  %v758_v24 = vrot.slane %v748_v19, 4  ;;  %v3038_v25 = vpop.f32.mrb[5].mxu1 }
 0x3c8   :  { %v759_v54 = vrot.slane %v748_v19, 5  ;;  %v760_v26 = vrot.slane %v748_v19, 6  ;;  %v761_v28 = vrot.slane %v748_v19, 7  ;;  %v770_v57 = vadd.f32 %v748_v19, %v264_v21  ;;  %v751_v30 = vpop.f32.mrb[6].mxu1 }
 0x3c9   :  { %v771_v31 = vadd.f32 %v755_v20, %v265_v3  ;;  %v772_v0 = vadd.f32 %v756_v22, %v266_v5  ;;  %v773_v4 = vadd.f32 %v757_v23, %v267_v6  ;;  %v774_v32 = vadd.f32 %v758_v24, %v268_v9  ;;  %v3039_v34 = vpop.f32.mrb[7].mxu1 }
 0x3ca   :  { %v775_v36 = vadd.f32 %v759_v54, %v269_v11  ;;  %v776_v37 = vadd.f32 %v760_v26, %v270_v15  ;;  %v777_v8 = vadd.f32 %v761_v28, %v271_v17  ;;  %3175 = vtanh.f32 %v770_v57 }
 0x3cb   :  { %3177 = vtanh.f32 %v771_v31  ;;  %v2909_v49 = vmul.f32 -1.442695, %v770_v57  ;;  %v2910_v50 = vmul.f32 -1.442695, %v771_v31  ;;  %v2911_v52 = vmul.f32 -1.442695, %v772_v0 }
 0x3cc   :  { %3179 = vtanh.f32 %v772_v0  ;;  %v2913_v53 = vmul.f32 -1.442695, %v774_v32  ;;  %v2912_v55 = vmul.f32 -1.442695, %v773_v4  ;;  %v2915_v58 = vmul.f32 -1.442695, %v776_v37 }
 0x3cd   :  { %3181 = vtanh.f32 %v774_v32  ;;  %v2914_v61 = vmul.f32 -1.442695, %v775_v36  ;;  %v2916_v63 = vmul.f32 -1.442695, %v777_v8 }
 0x3ce   :  { %3183 = vtanh.f32 %v773_v4 }
 0x3cf   :  { %3185 = vtanh.f32 %v776_v37 }
 0x3d0   :  { %3187 = vtanh.f32 %v775_v36 }
 0x3d1   :  { %3189 = vtanh.f32 %v777_v8 }
 0x3d2   :  { %3191 = vpow2.f32 %v2909_v49 }
 0x3d3   :  { %3193 = vpow2.f32 %v2910_v50 }
 0x3d4   :  { %v3176_v40 = vpop.eup %3175  ;;  %3195 = vpow2.f32 %v2911_v52 }
 0x3d5   :  { %850 = vrot.lane.b32.xlu1 %v3176_v40, %s3651_s0  ;;  %v3178_v41 = vpop.eup %3177  ;;  %3197 = vpow2.f32 %v2913_v53 }
 0x3d6   :  { %v3180_v42 = vpop.eup %3179  ;;  %3199 = vpow2.f32 %v2912_v55 }
 0x3d7   :  { %854 = vrot.lane.b32.xlu0 %v3180_v42, %s3651_s0  ;;  %v3182_v43 = vpop.eup %3181  ;;  %3201 = vpow2.f32 %v2915_v58 }
 0x3d8   :  { %v3184_v45 = vpop.eup %3183 }
 0x3d9   :  { %852 = vrot.lane.b32.xlu1 %v3178_v41, %s3651_s0  ;;  %v3186_v46 = vpop.eup %3185 }
 0x3da   :  { %v3188_v48 = vpop.eup %3187 }
 0x3db   :  { %856 = vrot.lane.b32.xlu0 %v3184_v45, %s3651_s0  ;;  %v3190_v12 = vpop.eup %3189 }
 0x3dc   :  { %v3192_v16 = vpop.eup %3191 }
 0x3dd   :  { %858 = vrot.lane.b32.xlu1 %v3182_v43, %s3651_s0  ;;  %v802_v59 = vadd.f32 1.0, %v3192_v16  ;;  %v3194_v2 = vpop.eup %3193 }
 0x3de   :  { %v3196_v21 = vpop.eup %3195  ;;  %v803_v3 = vadd.f32 1.0, %v3194_v2 }
 0x3df   :  { %860 = vrot.lane.b32.xlu0 %v3188_v48, %s3651_s0  ;;  %3203 = vrcp.f32 %v802_v59  ;;  %v3198_v5 = vpop.eup %3197  ;;  %v804_v6 = vadd.f32 1.0, %v3196_v21 }
 0x3e0   :  { %3205 = vpow2.f32 %v2914_v61  ;;  %v3200_v9 = vpop.eup %3199  ;;  %v806_v15 = vadd.f32 1.0, %v3198_v5 }
 0x3e1   :  { %862 = vrot.lane.b32.xlu1 %v3186_v46, %s3651_s0  ;;  %3207 = vpow2.f32 %v2916_v63  ;;  %v3202_v11 = vpop.eup %3201  ;;  %v805_v20 = vadd.f32 1.0, %v3200_v9 }
 0x3e2   :  { %3209 = vrcp.f32 %v803_v3  ;;  %v808_v24 = vadd.f32 1.0, %v3202_v11 }
 0x3e3   :  { %864 = vrot.lane.b32.xlu0 %v3190_v12, %s3651_s0  ;;  %3211 = vrcp.f32 %v804_v6 }
 0x3e4   :  { %3213 = vrcp.f32 %v806_v15 }
 0x3e5   :  { %3215 = vrcp.f32 %v805_v20 }
 0x3e6   :  { %3217 = vrcp.f32 %v808_v24 }
 0x3e9   :  { %v3919_v17 = vpop.eup %3203 }
 0x3ea   :  { %v3206_v22 = vpop.eup %3205  ;;  %v834_v52 = vmul.f32 %v3919_v17, %v3846_v29 }
 0x3eb   :  { %v807_v25 = vadd.f32 1.0, %v3206_v22  ;;  %v3208_v54 = vpop.eup %3207 }
 0x3ec   :  { %v809_v26 = vadd.f32 1.0, %v3208_v54  ;;  %v3923_v28 = vpop.eup %3209 }
 0x3ed   :  { %3219 = vrcp.f32 %v807_v25  ;;  %v3925_v30 = vpop.eup %3211  ;;  %v835_v55 = vmul.f32 %v3923_v28, %v3852_v33 }
 0x3ee   :  { %3221 = vrcp.f32 %v809_v26  ;;  %v3930_v32 = vpop.eup %3213  ;;  %v836_v58 = vmul.f32 %v3925_v30, %v3844_v27 }
 0x3ef   :  { %v3933_v36 = vpop.eup %3215  ;;  %v838_v29 = vmul.f32 %v3930_v32, %v3859_v39 }
 0x3f0   :  { %v3938_v41 = vpop.eup %3217  ;;  %v837_v33 = vmul.f32 %v3933_v36, %v3854_v35 }
 0x3f1   :  { %v840_v9 = vmul.f32 %v3938_v41, %v3866_v47 }
 0x3f7   :  { %v3941_v43 = vpop.eup %3219 }
 0x3f8   :  { %v3947_v12 = vpop.eup %3221  ;;  %v839_v39 = vmul.f32 %v3941_v43, %v3864_v44 }
 0x3f9   :  { %v841_v20 = vmul.f32 %v3947_v12, %v3873_v51 }
 0x447   :  { %v851_v19 = vpop.permute.xlu1 %850 }
 0x448   :  { %v874_v23 = vmul.f32 %v3919_v17, %v851_v19 }
 0x449   :  { %v855_v31 = vpop.permute.xlu0 %854 }
 0x44a   :  { %890 = vrot.lane.b32.xlu1 %v874_v23, %s3652_s7  ;;  %v876_v4 = vmul.f32 %v3925_v30, %v855_v31 }
 0x44b   :  { %v853_v57 = vpop.permute.xlu1 %852 }
 0x44c   :  { %v875_v0 = vmul.f32 %v3923_v28, %v853_v57  ;;  %894 = vrot.lane.b32.xlu0 %v876_v4, %s3652_s7 }
 0x44d   :  { %v857_v37 = vpop.permute.xlu0 %856 }
 0x44e   :  { %892 = vrot.lane.b32.xlu1 %v875_v0, %s3652_s7  ;;  %v877_v40 = vmul.f32 %v3933_v36, %v857_v37 }
 0x44f   :  { %v859_v34 = vpop.permute.xlu1 %858 }
 0x450   :  { %v878_v8 = vmul.f32 %v3930_v32, %v859_v34  ;;  %896 = vrot.lane.b32.xlu0 %v877_v40, %s3652_s7 }
 0x451   :  { %v861_v45 = vpop.permute.xlu0 %860 }
 0x452   :  { %898 = vrot.lane.b32.xlu1 %v878_v8, %s3652_s7  ;;  %v879_v48 = vmul.f32 %v3941_v43, %v861_v45 }
 0x453   :  { %v863_v42 = vpop.permute.xlu1 %862 }
 0x454   :  { %v880_v46 = vmul.f32 %v3938_v41, %v863_v42  ;;  %900 = vrot.lane.b32.xlu0 %v879_v48, %s3652_s7 }
 0x455   :  { %v865_v49 = vpop.permute.xlu0 %864 }
 0x456   :  { %902 = vrot.lane.b32.xlu1 %v880_v46, %s3652_s7  ;;  %v881_v50 = vmul.f32 %v3947_v12, %v865_v49 }
 0x458   :  { %904 = vrot.lane.b32.xlu0 %v881_v50, %s3652_s7 }
 0x4bc   :  { %v891_v53 = vpop.permute.xlu1 %890 }
 0x4bd   :  { %v3953_v16 = vadd.f32 %v891_v53, %v834_v52 }
 0x4be   :  { %v895_v61 = vpop.permute.xlu0 %894 }
 0x4bf   :  { %3223 = vtanh.f32 %v3953_v16  ;;  %v3962_v2 = vadd.f32 %v895_v61, %v836_v58 }
 0x4c0   :  { %v893_v59 = vpop.permute.xlu1 %892 }
 0x4c1   :  { %v3960_v63 = vadd.f32 %v893_v59, %v835_v55 }
 0x4c2   :  { %v897_v5 = vpop.permute.xlu0 %896 }
 0x4c3   :  { %3225 = vtanh.f32 %v3960_v63  ;;  %v3973_v6 = vadd.f32 %v897_v5, %v837_v33 }
 0x4c4   :  { %3227 = vtanh.f32 %v3962_v2  ;;  %v899_v3 = vpop.permute.xlu1 %898 }
 0x4c5   :  { %v3970_v27 = vadd.f32 %v899_v3, %v838_v29 }
 0x4c6   :  { %v901_v35 = vpop.permute.xlu0 %900 }
 0x4c7   :  { %3229 = vtanh.f32 %v3970_v27  ;;  %v3983_v19 = vadd.f32 %v901_v35, %v839_v39 }
 0x4c8   :  { %3231 = vtanh.f32 %v3973_v6  ;;  %v903_v11 = vpop.permute.xlu1 %902 }
 0x4c9   :  { %v3224_v21 = vpop.eup %3223  ;;  %v3981_v15 = vadd.f32 %v903_v11, %v840_v9 }
 0x4ca   :  { %938 = vrot.lane.b32.xlu1 %v3224_v21, %s3653_s8  ;;  %v905_v47 = vpop.permute.xlu0 %904 }
 0x4cb   :  { %3233 = vtanh.f32 %v3981_v15  ;;  %v3989_v24 = vadd.f32 %v905_v47, %v841_v20 }
 0x4cc   :  { %3235 = vtanh.f32 %v3983_v19 }
 0x4cd   :  { %v3226_v22 = vpop.eup %3225  ;;  %3237 = vtanh.f32 %v3989_v24 }
 0x4ce   :  { %v3228_v23 = vpop.eup %3227  ;;  %940 = vrot.lane.b32.xlu1 %v3226_v22, %s3653_s8 }
 0x4cf   :  { %942 = vrot.lane.b32.xlu0 %v3228_v23, %s3653_s8 }
 0x4d1   :  { %v3230_v44 = vpop.eup %3229 }
 0x4d2   :  { %v3232_v25 = vpop.eup %3231  ;;  %946 = vrot.lane.b32.xlu1 %v3230_v44, %s3653_s8 }
 0x4d3   :  { %944 = vrot.lane.b32.xlu0 %v3232_v25, %s3653_s8 }
 0x4d5   :  { %v3234_v54 = vpop.eup %3233 }
 0x4d6   :  { %v3236_v26 = vpop.eup %3235  ;;  %950 = vrot.lane.b32.xlu1 %v3234_v54, %s3653_s8 }
 0x4d7   :  { %948 = vrot.lane.b32.xlu0 %v3236_v26, %s3653_s8  ;;  %v3238_v51 = vpop.eup %3237 }
 0x4db   :  { %952 = vrot.lane.b32.xlu0 %v3238_v51, %s3653_s8 }
 0x53c   :  { %v939_v57 = vpop.permute.xlu1 %938 }
 0x53d   :  { %v962_v31 = vmul.f32 %v3919_v17, %v939_v57 }
 0x53f   :  { %v970_v8 = vpack.c.bf16 %v962_v31, %v962_v31 }
 0x540   :  { %v941_v0 = vpop.permute.xlu1 %940 }
 0x541   :  { %v943_v4 = vpop.permute.xlu0 %942  ;;  %v963_v34 = vmul.f32 %v3923_v28, %v941_v0  ;;  %v986_v53 = vunpack.c.l.b16 %v970_v8  ;;  %v284_v8 = vrot.slane %v3792_v10, 2 }
 0x542   :  { %v964_v37 = vmul.f32 %v3925_v30, %v943_v4  ;;  %v281_v4 = vrot.slane %v3785_v1, 2 }
 0x543   :  { %v971_v40 = vpack.c.bf16 %v963_v34, %v963_v34  ;;  %v282_v34 = vrot.slane %v3778_v56, 2 }
 0x544   :  { %v972_v42 = vpack.c.bf16 %v964_v37, %v964_v37  ;;  %v947_v45 = vpop.permute.xlu1 %946  ;;  %v283_v37 = vrot.slane %v3782_v62, 2 }
 0x545   :  { %v987_v46 = vunpack.c.l.b16 %v971_v40  ;;  %v945_v48 = vpop.permute.xlu0 %944  ;;  %v966_v49 = vmul.f32 %v3930_v32, %v947_v45  ;;  %v285_v40 = vrot.slane %v3797_v18, 2  ;;  %v287_v45 = vrot.slane %v3794_v13, 2 }
 0x546   :  { %v988_v50 = vunpack.c.l.b16 %v972_v42  ;;  %v965_v52 = vmul.f32 %v3933_v36, %v945_v48  ;;  %v286_v42 = vrot.slane %v3790_v7, 2 }
 0x547   :  { %v994_v55 = vrot.slane %v987_v46, 7  ;;  %v974_v17 = vpack.c.bf16 %v966_v49, %v966_v49 }
 0x548   :  { %v973_v58 = vpack.c.bf16 %v965_v52, %v965_v52  ;;  %v951_v59 = vpop.permute.xlu1 %950  ;;  %v996_v61 = vrot.slane %v988_v50, 6 }
 0x549   :  { %v995_v28 = vsel %vm688_vm6, %v994_v55, %v986_v53  ;;  %v990_v30 = vunpack.c.l.b16 %v974_v17  ;;  %v949_v29 = vpop.permute.xlu0 %948  ;;  %v968_v21 = vmul.f32 %v3938_v41, %v951_v59 }
 0x54a   :  { %v989_v33 = vunpack.c.l.b16 %v973_v58  ;;  %v967_v3 = vmul.f32 %v3941_v43, %v949_v29  ;;  %v997_v32 = vsel %vm691_vm7, %v996_v61, %v995_v28 }
 0x54b   :  { %v1000_v5 = vrot.slane %v990_v30, 4  ;;  %v976_v9 = vpack.c.bf16 %v968_v21, %v968_v21 }
 0x54c   :  { %v998_v36 = vrot.slane %v989_v33, 5  ;;  %v975_v39 = vpack.c.bf16 %v967_v3, %v967_v3 }
 0x54d   :  { %v992_v11 = vunpack.c.l.b16 %v976_v9  ;;  %v953_v35 = vpop.permute.xlu0 %952 }
 0x54e   :  { %v999_v20 = vsel %vm694_vm8, %v998_v36, %v997_v32  ;;  %v991_v22 = vunpack.c.l.b16 %v975_v39  ;;  %v969_v47 = vmul.f32 %v3947_v12, %v953_v35  ;;  %v280_v12 = vrot.slane %v3780_v60, 2 }
 0x54f   :  { %v1001_v23 = vsel %vm697_vm9, %v1000_v5, %v999_v20  ;;  %v1004_v44 = vrot.slane %v992_v11, 2 }
 0x550   :  { %v1002_v41 = vrot.slane %v991_v22, 3  ;;  %v977_v25 = vpack.c.bf16 %v969_v47, %v969_v47 }
 0x552   :  { %v1003_v43 = vsel %vm700_vm10, %v1002_v41, %v1001_v23  ;;  %v993_v54 = vunpack.c.l.b16 %v977_v25 }
 0x553   :  { %v1005_v26 = vsel %vm703_vm11, %v1004_v44, %v1003_v43 }
 0x554   :  { %v1006_v51 = vrot.slane %v993_v54, 1 }
 0x556   :  { %v1007_v57 = vsel %vm706_vm12, %v1006_v51, %v1005_v26 }
 0x557   :  { %v1008_v31 = vpack.c.b16 %v1007_v57, %v1007_v57 }
 0x559   :  { %1009 = vrot.lane.b32.xlu1 %v1008_v31, %s3654_s9 }
 0x5cb   :  { %v1010_v0 = vpop.permute.xlu1 %1009 }
 0x5cc   :  { %3043 = vmatmul.mubr.msk.bf16.vlgmr.msra.gmra.mrb[8].mxu1 %vm403_vm13, %v1010_v0 }
 0x5cd   :  { %3047 = vmatpush3.bf16.msra.mxu1 %v3739_v38  ;;  %3048 = vmatprep.mubr.msk.bf16.mxu1 %vm3649_vm3, %v3648_v14 }
 0x5ce   :  { %3058 = vmatprep.subr.bf16.mxu1 %v3648_v14 }
 0x69f   :  { %v1048_v46 = vpop.f32.mrb[8].mxu1 }
 0x6a0   :  { %v1055_v48 = vrot.slane %v1048_v46, 1  ;;  %v1056_v49 = vrot.slane %v1048_v46, 2  ;;  %v1057_v50 = vrot.slane %v1048_v46, 3  ;;  %v1058_v52 = vrot.slane %v1048_v46, 4  ;;  %v3044_v53 = vpop.f32.mrb[9].mxu1 }
 0x6a1   :  { %v1059_v55 = vrot.slane %v1048_v46, 5  ;;  %v1060_v17 = vrot.slane %v1048_v46, 6  ;;  %v1061_v58 = vrot.slane %v1048_v46, 7  ;;  %v1070_v59 = vadd.f32 %v1048_v46, %v280_v12  ;;  %v1051_v61 = vpop.f32.mrb[10].mxu1 }
 0x6a2   :  { %v1071_v28 = vadd.f32 %v1055_v48, %v281_v4  ;;  %v1072_v30 = vadd.f32 %v1056_v49, %v282_v34  ;;  %v1073_v29 = vadd.f32 %v1057_v50, %v283_v37  ;;  %v1074_v21 = vadd.f32 %v1058_v52, %v284_v8  ;;  %v3045_v33 = vpop.f32.mrb[11].mxu1 }
 0x6a3   :  { %v1075_v3 = vadd.f32 %v1059_v55, %v285_v40  ;;  %v1076_v32 = vadd.f32 %v1060_v17, %v286_v42  ;;  %v1077_v5 = vadd.f32 %v1061_v58, %v287_v45  ;;  %3239 = vtanh.f32 %v1070_v59 }
 0x6a4   :  { %3241 = vtanh.f32 %v1071_v28  ;;  %v2918_v23 = vmul.f32 -1.442695, %v1070_v59  ;;  %v2919_v44 = vmul.f32 -1.442695, %v1071_v28  ;;  %v2920_v41 = vmul.f32 -1.442695, %v1072_v30 }
 0x6a5   :  { %3243 = vtanh.f32 %v1072_v30  ;;  %v2922_v25 = vmul.f32 -1.442695, %v1074_v21  ;;  %v2921_v54 = vmul.f32 -1.442695, %v1073_v29  ;;  %v2924_v26 = vmul.f32 -1.442695, %v1076_v32 }
 0x6a6   :  { %3245 = vtanh.f32 %v1074_v21  ;;  %v2923_v57 = vmul.f32 -1.442695, %v1075_v3  ;;  %v2925_v31 = vmul.f32 -1.442695, %v1077_v5 }
 0x6a7   :  { %3247 = vtanh.f32 %v1073_v29 }
 0x6a8   :  { %3249 = vtanh.f32 %v1076_v32 }
 0x6a9   :  { %3251 = vtanh.f32 %v1075_v3 }
 0x6aa   :  { %3253 = vtanh.f32 %v1077_v5 }
 0x6ab   :  { %3255 = vpow2.f32 %v2918_v23 }
 0x6ac   :  { %3257 = vpow2.f32 %v2919_v44 }
 0x6ad   :  { %v3240_v9 = vpop.eup %3239  ;;  %3259 = vpow2.f32 %v2920_v41 }
 0x6ae   :  { %1150 = vrot.lane.b32.xlu0 %v3240_v9, %s3651_s0  ;;  %v3242_v36 = vpop.eup %3241  ;;  %3261 = vpow2.f32 %v2922_v25 }
 0x6af   :  { %v3244_v39 = vpop.eup %3243  ;;  %3263 = vpow2.f32 %v2921_v54 }
 0x6b0   :  { %1154 = vrot.lane.b32.xlu1 %v3244_v39, %s3651_s0  ;;  %v3246_v11 = vpop.eup %3245  ;;  %3265 = vpow2.f32 %v2924_v26 }
 0x6b1   :  { %v3248_v35 = vpop.eup %3247 }
 0x6b2   :  { %1152 = vrot.lane.b32.xlu0 %v3242_v36, %s3651_s0  ;;  %v3250_v20 = vpop.eup %3249 }
 0x6b3   :  { %v3252_v22 = vpop.eup %3251 }
 0x6b4   :  { %1156 = vrot.lane.b32.xlu1 %v3248_v35, %s3651_s0  ;;  %v3254_v47 = vpop.eup %3253 }
 0x6b5   :  { %v3256_v43 = vpop.eup %3255 }
 0x6b6   :  { %1158 = vrot.lane.b32.xlu0 %v3246_v11, %s3651_s0  ;;  %v1102_v51 = vadd.f32 1.0, %v3256_v43  ;;  %v3258_v0 = vpop.eup %3257 }
 0x6b7   :  { %v3260_v12 = vpop.eup %3259  ;;  %v1103_v4 = vadd.f32 1.0, %v3258_v0 }
 0x6b8   :  { %1160 = vrot.lane.b32.xlu1 %v3252_v22, %s3651_s0  ;;  %3267 = vrcp.f32 %v1102_v51  ;;  %v3262_v34 = vpop.eup %3261  ;;  %v1104_v37 = vadd.f32 1.0, %v3260_v12 }
 0x6b9   :  { %3269 = vpow2.f32 %v2923_v57  ;;  %v3264_v8 = vpop.eup %3263  ;;  %v1106_v42 = vadd.f32 1.0, %v3262_v34 }
 0x6ba   :  { %1162 = vrot.lane.b32.xlu0 %v3250_v20, %s3651_s0  ;;  %3271 = vpow2.f32 %v2925_v31  ;;  %v3266_v40 = vpop.eup %3265  ;;  %v1105_v48 = vadd.f32 1.0, %v3264_v8 }
 0x6bb   :  { %3273 = vrcp.f32 %v1103_v4  ;;  %v1108_v52 = vadd.f32 1.0, %v3266_v40 }
 0x6bc   :  { %1164 = vrot.lane.b32.xlu1 %v3254_v47, %s3651_s0  ;;  %3275 = vrcp.f32 %v1104_v37 }
 0x6bd   :  { %3277 = vrcp.f32 %v1106_v42 }
 0x6be   :  { %3279 = vrcp.f32 %v1105_v48 }
 0x6bf   :  { %3281 = vrcp.f32 %v1108_v52 }
 0x6c2   :  { %v4036_v45 = vpop.eup %3267 }
 0x6c3   :  { %v3270_v49 = vpop.eup %3269  ;;  %v1134_v41 = vmul.f32 %v4036_v45, %v3953_v16 }
 0x6c4   :  { %v1107_v53 = vadd.f32 1.0, %v3270_v49  ;;  %v3272_v55 = vpop.eup %3271 }
 0x6c5   :  { %v1109_v17 = vadd.f32 1.0, %v3272_v55  ;;  %v4040_v58 = vpop.eup %3273 }
 0x6c6   :  { %3283 = vrcp.f32 %v1107_v53  ;;  %v4042_v61 = vpop.eup %3275  ;;  %v1135_v54 = vmul.f32 %v4040_v58, %v3960_v63 }
 0x6c7   :  { %3285 = vrcp.f32 %v1109_v17  ;;  %v4047_v21 = vpop.eup %3277  ;;  %v1136_v26 = vmul.f32 %v4042_v61, %v3962_v2 }
 0x6c8   :  { %v4050_v3 = vpop.eup %3279  ;;  %v1138_v16 = vmul.f32 %v4047_v21, %v3970_v27 }
 0x6c9   :  { %v4055_v36 = vpop.eup %3281  ;;  %v1137_v63 = vmul.f32 %v4050_v3, %v3973_v6 }
 0x6ca   :  { %v1140_v8 = vmul.f32 %v4055_v36, %v3981_v15 }
 0x6d0   :  { %v4058_v11 = vpop.eup %3283 }
 0x6d1   :  { %v4064_v47 = vpop.eup %3285  ;;  %v1139_v27 = vmul.f32 %v4058_v11, %v3983_v19 }
 0x6d2   :  { %v1141_v48 = vmul.f32 %v4064_v47, %v3989_v24 }
 0x720   :  { %v1151_v46 = vpop.permute.xlu0 %1150 }
 0x721   :  { %v1174_v50 = vmul.f32 %v4036_v45, %v1151_v46 }
 0x722   :  { %v1155_v28 = vpop.permute.xlu1 %1154 }
 0x723   :  { %1190 = vrot.lane.b32.xlu0 %v1174_v50, %s3652_s7  ;;  %v1176_v29 = vmul.f32 %v4042_v61, %v1155_v28 }
 0x724   :  { %v1153_v59 = vpop.permute.xlu0 %1152 }
 0x725   :  { %v1175_v30 = vmul.f32 %v4040_v58, %v1153_v59  ;;  %1194 = vrot.lane.b32.xlu1 %v1176_v29, %s3652_s7 }
 0x726   :  { %v1157_v32 = vpop.permute.xlu1 %1156 }
 0x727   :  { %1192 = vrot.lane.b32.xlu0 %v1175_v30, %s3652_s7  ;;  %v1177_v9 = vmul.f32 %v4050_v3, %v1157_v32 }
 0x728   :  { %v1159_v33 = vpop.permute.xlu0 %1158 }
 0x729   :  { %v1178_v5 = vmul.f32 %v4047_v21, %v1159_v33  ;;  %1196 = vrot.lane.b32.xlu1 %v1177_v9, %s3652_s7 }
 0x72a   :  { %v1161_v35 = vpop.permute.xlu1 %1160 }
 0x72b   :  { %1198 = vrot.lane.b32.xlu0 %v1178_v5, %s3652_s7  ;;  %v1179_v22 = vmul.f32 %v4058_v11, %v1161_v35 }
 0x72c   :  { %v1163_v39 = vpop.permute.xlu0 %1162 }
 0x72d   :  { %v1180_v20 = vmul.f32 %v4055_v36, %v1163_v39  ;;  %1200 = vrot.lane.b32.xlu1 %v1179_v22, %s3652_s7 }
 0x72e   :  { %v1165_v23 = vpop.permute.xlu1 %1164 }
 0x72f   :  { %1202 = vrot.lane.b32.xlu0 %v1180_v20, %s3652_s7  ;;  %v1181_v44 = vmul.f32 %v4064_v47, %v1165_v23 }
 0x731   :  { %1204 = vrot.lane.b32.xlu1 %v1181_v44, %s3652_s7 }
 0x795   :  { %v1191_v25 = vpop.permute.xlu0 %1190 }
 0x796   :  { %v4070_v43 = vadd.f32 %v1191_v25, %v1134_v41 }
 0x797   :  { %v1195_v57 = vpop.permute.xlu1 %1194 }
 0x798   :  { %3287 = vtanh.f32 %v4070_v43  ;;  %v4079_v0 = vadd.f32 %v1195_v57, %v1136_v26 }
 0x799   :  { %v1193_v51 = vpop.permute.xlu0 %1192 }
 0x79a   :  { %v4077_v31 = vadd.f32 %v1193_v51, %v1135_v54 }
 0x79b   :  { %v1197_v34 = vpop.permute.xlu1 %1196 }
 0x79c   :  { %3289 = vtanh.f32 %v4077_v31  ;;  %v4090_v37 = vadd.f32 %v1197_v34, %v1137_v63 }
 0x79d   :  { %3291 = vtanh.f32 %v4079_v0  ;;  %v1199_v4 = vpop.permute.xlu0 %1198 }
 0x79e   :  { %v4087_v2 = vadd.f32 %v1199_v4, %v1138_v16 }
 0x79f   :  { %v1201_v6 = vpop.permute.xlu1 %1200 }
 0x7a0   :  { %3293 = vtanh.f32 %v4087_v2  ;;  %v4100_v46 = vadd.f32 %v1201_v6, %v1139_v27 }
 0x7a1   :  { %3295 = vtanh.f32 %v4090_v37  ;;  %v1203_v40 = vpop.permute.xlu0 %1202 }
 0x7a2   :  { %v3288_v12 = vpop.eup %3287  ;;  %v4098_v42 = vadd.f32 %v1203_v40, %v1140_v8 }
 0x7a3   :  { %1238 = vrot.lane.b32.xlu0 %v3288_v12, %s3653_s8  ;;  %v1205_v15 = vpop.permute.xlu1 %1204 }
 0x7a4   :  { %3297 = vtanh.f32 %v4098_v42  ;;  %v4106_v52 = vadd.f32 %v1205_v15, %v1141_v48 }
 0x7a5   :  { %3299 = vtanh.f32 %v4100_v46 }
 0x7a6   :  { %v3290_v49 = vpop.eup %3289  ;;  %3301 = vtanh.f32 %v4106_v52 }
 0x7a7   :  { %v3292_v50 = vpop.eup %3291  ;;  %1240 = vrot.lane.b32.xlu0 %v3290_v49, %s3653_s8 }
 0x7a8   :  { %1242 = vrot.lane.b32.xlu1 %v3292_v50, %s3653_s8 }
 0x7aa   :  { %v3294_v19 = vpop.eup %3293 }
 0x7ab   :  { %v3296_v53 = vpop.eup %3295  ;;  %1246 = vrot.lane.b32.xlu0 %v3294_v19, %s3653_s8 }
 0x7ac   :  { %1244 = vrot.lane.b32.xlu1 %v3296_v53, %s3653_s8 }
 0x7ae   :  { %v3298_v55 = vpop.eup %3297 }
 0x7af   :  { %v3300_v17 = vpop.eup %3299  ;;  %1250 = vrot.lane.b32.xlu0 %v3298_v55, %s3653_s8 }
 0x7b0   :  { %1248 = vrot.lane.b32.xlu1 %v3300_v17, %s3653_s8  ;;  %v3302_v24 = vpop.eup %3301 }
 0x7b4   :  { %1252 = vrot.lane.b32.xlu1 %v3302_v24, %s3653_s8 }
 0x815   :  { %v1239_v59 = vpop.permute.xlu0 %1238 }
 0x816   :  { %v1262_v28 = vmul.f32 %v4036_v45, %v1239_v59 }
 0x818   :  { %v1270_v5 = vpack.c.bf16 %v1262_v28, %v1262_v28 }
 0x819   :  { %v1241_v30 = vpop.permute.xlu0 %1240 }
 0x81a   :  { %v1243_v29 = vpop.permute.xlu1 %1242  ;;  %v1263_v33 = vmul.f32 %v4040_v58, %v1241_v30  ;;  %v1286_v25 = vunpack.c.l.b16 %v1270_v5  ;;  %v300_v5 = vrot.slane %v3792_v10, 3 }
 0x81b   :  { %v1264_v32 = vmul.f32 %v4042_v61, %v1243_v29  ;;  %v297_v29 = vrot.slane %v3785_v1, 3 }
 0x81c   :  { %v1271_v9 = vpack.c.bf16 %v1263_v33, %v1263_v33  ;;  %v298_v33 = vrot.slane %v3778_v56, 3 }
 0x81d   :  { %v1272_v39 = vpack.c.bf16 %v1264_v32, %v1264_v32  ;;  %v1247_v35 = vpop.permute.xlu0 %1246  ;;  %v299_v32 = vrot.slane %v3782_v62, 3 }
 0x81e   :  { %v1287_v20 = vunpack.c.l.b16 %v1271_v9  ;;  %v1245_v22 = vpop.permute.xlu1 %1244  ;;  %v1266_v23 = vmul.f32 %v4047_v21, %v1247_v35  ;;  %v301_v9 = vrot.slane %v3797_v18, 3  ;;  %v303_v35 = vrot.slane %v3794_v13, 3 }
 0x81f   :  { %v1288_v44 = vunpack.c.l.b16 %v1272_v39  ;;  %v1265_v41 = vmul.f32 %v4050_v3, %v1245_v22  ;;  %v302_v39 = vrot.slane %v3790_v7, 3 }
 0x820   :  { %v1294_v54 = vrot.slane %v1287_v20, 7  ;;  %v1274_v45 = vpack.c.bf16 %v1266_v23, %v1266_v23 }
 0x821   :  { %v1273_v26 = vpack.c.bf16 %v1265_v41, %v1265_v41  ;;  %v1251_v51 = vpop.permute.xlu0 %1250  ;;  %v1296_v57 = vrot.slane %v1288_v44, 6 }
 0x822   :  { %v1295_v58 = vsel %vm688_vm6, %v1294_v54, %v1286_v25  ;;  %v1290_v61 = vunpack.c.l.b16 %v1274_v45  ;;  %v1249_v16 = vpop.permute.xlu1 %1248  ;;  %v1268_v12 = vmul.f32 %v4055_v36, %v1251_v51 }
 0x823   :  { %v1289_v63 = vunpack.c.l.b16 %v1273_v26  ;;  %v1267_v4 = vmul.f32 %v4058_v11, %v1249_v16  ;;  %v1297_v21 = vsel %vm691_vm7, %v1296_v57, %v1295_v58 }
 0x824   :  { %v1300_v34 = vrot.slane %v1290_v61, 4  ;;  %v1276_v8 = vpack.c.bf16 %v1268_v12, %v1268_v12 }
 0x825   :  { %v1298_v3 = vrot.slane %v1289_v63, 5  ;;  %v1275_v27 = vpack.c.bf16 %v1267_v4, %v1267_v4 }
 0x826   :  { %v1292_v40 = vunpack.c.l.b16 %v1276_v8  ;;  %v1253_v6 = vpop.permute.xlu1 %1252 }
 0x827   :  { %v1299_v48 = vsel %vm694_vm8, %v1298_v3, %v1297_v21  ;;  %v1291_v49 = vunpack.c.l.b16 %v1275_v27  ;;  %v1269_v15 = vmul.f32 %v4064_v47, %v1253_v6  ;;  %v296_v47 = vrot.slane %v3780_v60, 3 }
 0x828   :  { %v1301_v50 = vsel %vm697_vm9, %v1300_v34, %v1299_v48  ;;  %v1304_v19 = vrot.slane %v1292_v40, 2 }
 0x829   :  { %v1302_v36 = vrot.slane %v1291_v49, 3  ;;  %v1277_v53 = vpack.c.bf16 %v1269_v15, %v1269_v15 }
 0x82b   :  { %v1303_v11 = vsel %vm700_vm10, %v1302_v36, %v1301_v50  ;;  %v1293_v55 = vunpack.c.l.b16 %v1277_v53 }
 0x82c   :  { %v1305_v17 = vsel %vm703_vm11, %v1304_v19, %v1303_v11 }
 0x82d   :  { %v1306_v24 = vrot.slane %v1293_v55, 1 }
 0x82f   :  { %v1307_v59 = vsel %vm706_vm12, %v1306_v24, %v1305_v17 }
 0x830   :  { %v1308_v28 = vpack.c.b16 %v1307_v59, %v1307_v59 }
 0x832   :  { %1309 = vrot.lane.b32.xlu0 %v1308_v28, %s3654_s9 }
 0x8a4   :  { %v1310_v30 = vpop.permute.xlu0 %1309 }
 0x8a5   :  { %3049 = vmatmul.mubr.msk.bf16.vlgmr.msra.gmra.mrb[12].mxu1 %vm403_vm13, %v1310_v30 }
 0x8a6   :  { %3059 = vmatpush3.bf16.msra.mxu1 %v3739_v38  ;;  %3060 = vmatprep.mubr.msk.bf16.mxu1 %vm3649_vm3, %v3648_v14 }
 0x8a7   :  { %3070 = vmatprep.subr.bf16.mxu1 %v3648_v14 }
 0x978   :  { %v1348_v20 = vpop.f32.mrb[12].mxu1 }
 0x979   :  { %v1355_v22 = vrot.slane %v1348_v20, 1  ;;  %v1356_v23 = vrot.slane %v1348_v20, 2  ;;  %v1357_v44 = vrot.slane %v1348_v20, 3  ;;  %v1358_v41 = vrot.slane %v1348_v20, 4  ;;  %v3050_v25 = vpop.f32.mrb[13].mxu1 }
 0x97a   :  { %v1359_v54 = vrot.slane %v1348_v20, 5  ;;  %v1360_v45 = vrot.slane %v1348_v20, 6  ;;  %v1361_v26 = vrot.slane %v1348_v20, 7  ;;  %v1370_v51 = vadd.f32 %v1348_v20, %v296_v47  ;;  %v1351_v57 = vpop.f32.mrb[14].mxu1 }
 0x97b   :  { %v1371_v58 = vadd.f32 %v1355_v22, %v297_v29  ;;  %v1372_v61 = vadd.f32 %v1356_v23, %v298_v33  ;;  %v1373_v16 = vadd.f32 %v1357_v44, %v299_v32  ;;  %v1374_v12 = vadd.f32 %v1358_v41, %v300_v5  ;;  %v3051_v63 = vpop.f32.mrb[15].mxu1 }
 0x97c   :  { %v1375_v4 = vadd.f32 %v1359_v54, %v301_v9  ;;  %v1376_v21 = vadd.f32 %v1360_v45, %v302_v39  ;;  %v1377_v34 = vadd.f32 %v1361_v26, %v303_v35  ;;  %3303 = vtanh.f32 %v1370_v51 }
 0x97d   :  { %3305 = vtanh.f32 %v1371_v58  ;;  %v2927_v50 = vmul.f32 -1.442695, %v1370_v51  ;;  %v2928_v19 = vmul.f32 -1.442695, %v1371_v58  ;;  %v2929_v36 = vmul.f32 -1.442695, %v1372_v61 }
 0x97e   :  { %3307 = vtanh.f32 %v1372_v61  ;;  %v2931_v53 = vmul.f32 -1.442695, %v1374_v12  ;;  %v2930_v55 = vmul.f32 -1.442695, %v1373_v16  ;;  %v2933_v17 = vmul.f32 -1.442695, %v1376_v21 }
 0x97f   :  { %3309 = vtanh.f32 %v1374_v12  ;;  %v2932_v59 = vmul.f32 -1.442695, %v1375_v4  ;;  %v2934_v28 = vmul.f32 -1.442695, %v1377_v34 }
 0x980   :  { %3311 = vtanh.f32 %v1373_v16 }
 0x981   :  { %3313 = vtanh.f32 %v1376_v21 }
 0x982   :  { %3315 = vtanh.f32 %v1375_v4 }
 0x983   :  { %3317 = vtanh.f32 %v1377_v34 }
 0x984   :  { %3319 = vpow2.f32 %v2927_v50 }
 0x985   :  { %3321 = vpow2.f32 %v2928_v19 }
 0x986   :  { %v3304_v8 = vpop.eup %3303  ;;  %3323 = vpow2.f32 %v2929_v36 }
 0x987   :  { %1450 = vrot.lane.b32.xlu1 %v3304_v8, %s3651_s0  ;;  %v3306_v3 = vpop.eup %3305  ;;  %3325 = vpow2.f32 %v2931_v53 }
 0x988   :  { %v3308_v27 = vpop.eup %3307  ;;  %3327 = vpow2.f32 %v2930_v55 }
 0x989   :  { %1454 = vrot.lane.b32.xlu0 %v3308_v27, %s3651_s0  ;;  %v3310_v40 = vpop.eup %3309  ;;  %3329 = vpow2.f32 %v2933_v17 }
 0x98a   :  { %v3312_v6 = vpop.eup %3311 }
 0x98b   :  { %1452 = vrot.lane.b32.xlu1 %v3306_v3, %s3651_s0  ;;  %v3314_v48 = vpop.eup %3313 }
 0x98c   :  { %v3316_v49 = vpop.eup %3315 }
 0x98d   :  { %1456 = vrot.lane.b32.xlu0 %v3312_v6, %s3651_s0  ;;  %v3318_v15 = vpop.eup %3317 }
 0x98e   :  { %v3320_v11 = vpop.eup %3319 }
 0x98f   :  { %1458 = vrot.lane.b32.xlu1 %v3310_v40, %s3651_s0  ;;  %v1402_v24 = vadd.f32 1.0, %v3320_v11  ;;  %v3322_v30 = vpop.eup %3321 }
 0x990   :  { %v3324_v47 = vpop.eup %3323  ;;  %v1403_v29 = vadd.f32 1.0, %v3322_v30 }
 0x991   :  { %1460 = vrot.lane.b32.xlu0 %v3316_v49, %s3651_s0  ;;  %3331 = vrcp.f32 %v1402_v24  ;;  %v3326_v33 = vpop.eup %3325  ;;  %v1404_v32 = vadd.f32 1.0, %v3324_v47 }
 0x992   :  { %3333 = vpow2.f32 %v2932_v59  ;;  %v3328_v5 = vpop.eup %3327  ;;  %v1406_v39 = vadd.f32 1.0, %v3326_v33 }
 0x993   :  { %1462 = vrot.lane.b32.xlu1 %v3314_v48, %s3651_s0  ;;  %3335 = vpow2.f32 %v2934_v28  ;;  %v3330_v9 = vpop.eup %3329  ;;  %v1405_v22 = vadd.f32 1.0, %v3328_v5 }
 0x994   :  { %3337 = vrcp.f32 %v1403_v29  ;;  %v1408_v41 = vadd.f32 1.0, %v3330_v9 }
 0x995   :  { %1464 = vrot.lane.b32.xlu0 %v3318_v15, %s3651_s0  ;;  %3339 = vrcp.f32 %v1404_v32 }
 0x996   :  { %3341 = vrcp.f32 %v1406_v39 }
 0x997   :  { %3343 = vrcp.f32 %v1405_v22 }
 0x998   :  { %3345 = vrcp.f32 %v1408_v41 }
 0x99b   :  { %v4153_v35 = vpop.eup %3331 }
 0x99c   :  { %v3334_v23 = vpop.eup %3333  ;;  %v1434_v36 = vmul.f32 %v4153_v35, %v4070_v43 }
 0x99d   :  { %v1407_v25 = vadd.f32 1.0, %v3334_v23  ;;  %v3336_v54 = vpop.eup %3335 }
 0x99e   :  { %v1409_v45 = vadd.f32 1.0, %v3336_v54  ;;  %v4157_v26 = vpop.eup %3337 }
 0x99f   :  { %3347 = vrcp.f32 %v1407_v25  ;;  %v4159_v57 = vpop.eup %3339  ;;  %v1435_v55 = vmul.f32 %v4157_v26, %v4077_v31 }
 0x9a0   :  { %3349 = vrcp.f32 %v1409_v45  ;;  %v4164_v12 = vpop.eup %3341  ;;  %v1436_v17 = vmul.f32 %v4159_v57, %v4079_v0 }
 0x9a1   :  { %v4167_v4 = vpop.eup %3343  ;;  %v1438_v43 = vmul.f32 %v4164_v12, %v4087_v2 }
 0x9a2   :  { %v4172_v3 = vpop.eup %3345  ;;  %v1437_v31 = vmul.f32 %v4167_v4, %v4090_v37 }
 0x9a3   :  { %v1440_v5 = vmul.f32 %v4172_v3, %v4098_v42 }
 0x9a9   :  { %v4175_v40 = vpop.eup %3347 }
 0x9aa   :  { %v4181_v15 = vpop.eup %3349  ;;  %v1439_v2 = vmul.f32 %v4175_v40, %v4100_v46 }
 0x9ab   :  { %v1441_v22 = vmul.f32 %v4181_v15, %v4106_v52 }
 0x9f9   :  { %v1451_v20 = vpop.permute.xlu1 %1450 }
 0x9fa   :  { %v1474_v44 = vmul.f32 %v4153_v35, %v1451_v20 }
 0x9fb   :  { %v1455_v58 = vpop.permute.xlu0 %1454 }
 0x9fc   :  { %1490 = vrot.lane.b32.xlu1 %v1474_v44, %s3652_s7  ;;  %v1476_v16 = vmul.f32 %v4159_v57, %v1455_v58 }
 0x9fd   :  { %v1453_v51 = vpop.permute.xlu1 %1452 }
 0x9fe   :  { %v1475_v61 = vmul.f32 %v4157_v26, %v1453_v51  ;;  %1494 = vrot.lane.b32.xlu0 %v1476_v16, %s3652_s7 }
 0x9ff   :  { %v1457_v21 = vpop.permute.xlu0 %1456 }
 0xa00   :  { %1492 = vrot.lane.b32.xlu1 %v1475_v61, %s3652_s7  ;;  %v1477_v8 = vmul.f32 %v4167_v4, %v1457_v21 }
 0xa01   :  { %v1459_v63 = vpop.permute.xlu1 %1458 }
 0xa02   :  { %v1478_v34 = vmul.f32 %v4164_v12, %v1459_v63  ;;  %1496 = vrot.lane.b32.xlu0 %v1477_v8, %s3652_s7 }
 0xa03   :  { %v1461_v6 = vpop.permute.xlu0 %1460 }
 0xa04   :  { %1498 = vrot.lane.b32.xlu1 %v1478_v34, %s3652_s7  ;;  %v1479_v49 = vmul.f32 %v4175_v40, %v1461_v6 }
 0xa05   :  { %v1463_v27 = vpop.permute.xlu1 %1462 }
 0xa06   :  { %v1480_v48 = vmul.f32 %v4172_v3, %v1463_v27  ;;  %1500 = vrot.lane.b32.xlu0 %v1479_v49, %s3652_s7 }
 0xa07   :  { %v1465_v50 = vpop.permute.xlu0 %1464 }
 0xa08   :  { %1502 = vrot.lane.b32.xlu1 %v1480_v48, %s3652_s7  ;;  %v1481_v19 = vmul.f32 %v4181_v15, %v1465_v50 }
 0xa0a   :  { %1504 = vrot.lane.b32.xlu0 %v1481_v19, %s3652_s7 }
 0xa6e   :  { %v1491_v53 = vpop.permute.xlu1 %1490 }
 0xa6f   :  { %v4187_v11 = vadd.f32 %v1491_v53, %v1434_v36 }
 0xa70   :  { %v1495_v59 = vpop.permute.xlu0 %1494 }
 0xa71   :  { %3351 = vtanh.f32 %v4187_v11  ;;  %v4196_v30 = vadd.f32 %v1495_v59, %v1436_v17 }
 0xa72   :  { %v1493_v24 = vpop.permute.xlu1 %1492 }
 0xa73   :  { %v4194_v28 = vadd.f32 %v1493_v24, %v1435_v55 }
 0xa74   :  { %v1497_v33 = vpop.permute.xlu0 %1496 }
 0xa75   :  { %3353 = vtanh.f32 %v4194_v28  ;;  %v4207_v32 = vadd.f32 %v1497_v33, %v1437_v31 }
 0xa76   :  { %3355 = vtanh.f32 %v4196_v30  ;;  %v1499_v29 = vpop.permute.xlu1 %1498 }
 0xa77   :  { %v4204_v0 = vadd.f32 %v1499_v29, %v1438_v43 }
 0xa78   :  { %v1501_v37 = vpop.permute.xlu0 %1500 }
 0xa79   :  { %3357 = vtanh.f32 %v4204_v0  ;;  %v4217_v20 = vadd.f32 %v1501_v37, %v1439_v2 }
 0xa7a   :  { %3359 = vtanh.f32 %v4207_v32  ;;  %v1503_v9 = vpop.permute.xlu1 %1502 }
 0xa7b   :  { %v3352_v47 = vpop.eup %3351  ;;  %v4215_v39 = vadd.f32 %v1503_v9, %v1440_v5 }
 0xa7c   :  { %1538 = vrot.lane.b32.xlu1 %v3352_v47, %s3653_s8  ;;  %v1505_v42 = vpop.permute.xlu0 %1504 }
 0xa7d   :  { %3361 = vtanh.f32 %v4215_v39  ;;  %v4223_v41 = vadd.f32 %v1505_v42, %v1441_v22 }
 0xa7e   :  { %3363 = vtanh.f32 %v4217_v20 }
 0xa7f   :  { %v3354_v23 = vpop.eup %3353  ;;  %3365 = vtanh.f32 %v4223_v41 }
 0xa80   :  { %v3356_v44 = vpop.eup %3355  ;;  %1540 = vrot.lane.b32.xlu1 %v3354_v23, %s3653_s8 }
 0xa81   :  { %1542 = vrot.lane.b32.xlu0 %v3356_v44, %s3653_s8 }
 0xa83   :  { %v3358_v46 = vpop.eup %3357 }
 0xa84   :  { %v3360_v25 = vpop.eup %3359  ;;  %1546 = vrot.lane.b32.xlu1 %v3358_v46, %s3653_s8 }
 0xa85   :  { %1544 = vrot.lane.b32.xlu0 %v3360_v25, %s3653_s8 }
 0xa87   :  { %v3362_v54 = vpop.eup %3361 }
 0xa88   :  { %v3364_v45 = vpop.eup %3363  ;;  %1550 = vrot.lane.b32.xlu1 %v3362_v54, %s3653_s8 }
 0xa89   :  { %1548 = vrot.lane.b32.xlu0 %v3364_v45, %s3653_s8  ;;  %v3366_v52 = vpop.eup %3365 }
 0xa8d   :  { %1552 = vrot.lane.b32.xlu0 %v3366_v52, %s3653_s8 }
 0xaee   :  { %v1539_v51 = vpop.permute.xlu1 %1538 }
 0xaef   :  { %v1562_v58 = vmul.f32 %v4153_v35, %v1539_v51 }
 0xaf1   :  { %v1570_v34 = vpack.c.bf16 %v1562_v58, %v1562_v58 }
 0xaf2   :  { %v1541_v61 = vpop.permute.xlu1 %1540 }
 0xaf3   :  { %v1543_v16 = vpop.permute.xlu0 %1542  ;;  %v1563_v63 = vmul.f32 %v4157_v26, %v1541_v61  ;;  %v1586_v53 = vunpack.c.l.b16 %v1570_v34  ;;  %v316_v34 = vrot.slane %v3792_v10, 4 }
 0xaf4   :  { %v1564_v21 = vmul.f32 %v4159_v57, %v1543_v16  ;;  %v313_v16 = vrot.slane %v3785_v1, 4 }
 0xaf5   :  { %v1571_v8 = vpack.c.bf16 %v1563_v63, %v1563_v63  ;;  %v314_v63 = vrot.slane %v3778_v56, 4 }
 0xaf6   :  { %v1572_v27 = vpack.c.bf16 %v1564_v21, %v1564_v21  ;;  %v1547_v6 = vpop.permute.xlu1 %1546  ;;  %v315_v21 = vrot.slane %v3782_v62, 4 }
 0xaf7   :  { %v1587_v48 = vunpack.c.l.b16 %v1571_v8  ;;  %v1545_v49 = vpop.permute.xlu0 %1544  ;;  %v1566_v50 = vmul.f32 %v4164_v12, %v1547_v6  ;;  %v317_v8 = vrot.slane %v3797_v18, 4  ;;  %v319_v6 = vrot.slane %v3794_v13, 4 }
 0xaf8   :  { %v1588_v19 = vunpack.c.l.b16 %v1572_v27  ;;  %v1565_v36 = vmul.f32 %v4167_v4, %v1545_v49  ;;  %v318_v27 = vrot.slane %v3790_v7, 4 }
 0xaf9   :  { %v1594_v55 = vrot.slane %v1587_v48, 7  ;;  %v1574_v35 = vpack.c.bf16 %v1566_v50, %v1566_v50 }
 0xafa   :  { %v1573_v17 = vpack.c.bf16 %v1565_v36, %v1565_v36  ;;  %v1551_v24 = vpop.permute.xlu1 %1550  ;;  %v1596_v59 = vrot.slane %v1588_v19, 6 }
 0xafb   :  { %v1595_v26 = vsel %vm688_vm6, %v1594_v55, %v1586_v53  ;;  %v1590_v57 = vunpack.c.l.b16 %v1574_v35  ;;  %v1549_v43 = vpop.permute.xlu0 %1548  ;;  %v1568_v47 = vmul.f32 %v4172_v3, %v1551_v24 }
 0xafc   :  { %v1589_v31 = vunpack.c.l.b16 %v1573_v17  ;;  %v1567_v29 = vmul.f32 %v4175_v40, %v1549_v43  ;;  %v1597_v12 = vsel %vm691_vm7, %v1596_v59, %v1595_v26 }
 0xafd   :  { %v1600_v33 = vrot.slane %v1590_v57, 4  ;;  %v1576_v5 = vpack.c.bf16 %v1568_v47, %v1568_v47 }
 0xafe   :  { %v1598_v4 = vrot.slane %v1589_v31, 5  ;;  %v1575_v2 = vpack.c.bf16 %v1567_v29, %v1567_v29 }
 0xaff   :  { %v1592_v9 = vunpack.c.l.b16 %v1576_v5  ;;  %v1553_v37 = vpop.permute.xlu0 %1552 }
 0xb00   :  { %v1599_v22 = vsel %vm694_vm8, %v1598_v4, %v1597_v12  ;;  %v1591_v23 = vunpack.c.l.b16 %v1575_v2  ;;  %v1569_v42 = vmul.f32 %v4181_v15, %v1553_v37  ;;  %v312_v15 = vrot.slane %v3780_v60, 4 }
 0xb01   :  { %v1601_v44 = vsel %vm697_vm9, %v1600_v33, %v1599_v22  ;;  %v1604_v46 = vrot.slane %v1592_v9, 2 }
 0xb02   :  { %v1602_v3 = vrot.slane %v1591_v23, 3  ;;  %v1577_v25 = vpack.c.bf16 %v1569_v42, %v1569_v42 }
 0xb04   :  { %v1603_v40 = vsel %vm700_vm10, %v1602_v3, %v1601_v44  ;;  %v1593_v54 = vunpack.c.l.b16 %v1577_v25 }
 0xb05   :  { %v1605_v45 = vsel %vm703_vm11, %v1604_v46, %v1603_v40 }
 0xb06   :  { %v1606_v52 = vrot.slane %v1593_v54, 1 }
 0xb08   :  { %v1607_v51 = vsel %vm706_vm12, %v1606_v52, %v1605_v45 }
 0xb09   :  { %v1608_v58 = vpack.c.b16 %v1607_v51, %v1607_v51 }
 0xb0b   :  { %1609 = vrot.lane.b32.xlu1 %v1608_v58, %s3654_s9 }
 0xb7d   :  { %v1610_v61 = vpop.permute.xlu1 %1609 }
 0xb7e   :  { %3055 = vmatmul.mubr.msk.bf16.vlgmr.msra.gmra.mrb[8].mxu0 %vm403_vm13, %v1610_v61 }
 0xb7f   :  { %3065 = vmatpush3.bf16.msra.mxu0 %v3739_v38  ;;  %3066 = vmatprep.mubr.msk.bf16.mxu0 %vm3649_vm3, %v3648_v14 }
 0xc51   :  { %v1648_v48 = vpop.f32.mrb[8].mxu0 }
 0xc52   :  { %v1655_v49 = vrot.slane %v1648_v48, 1  ;;  %v1656_v50 = vrot.slane %v1648_v48, 2  ;;  %v1657_v19 = vrot.slane %v1648_v48, 3  ;;  %v1658_v36 = vrot.slane %v1648_v48, 4  ;;  %v3056_v53 = vpop.f32.mrb[9].mxu0 }
 0xc53   :  { %v1659_v55 = vrot.slane %v1648_v48, 5  ;;  %v1660_v35 = vrot.slane %v1648_v48, 6  ;;  %v1661_v17 = vrot.slane %v1648_v48, 7  ;;  %v1670_v24 = vadd.f32 %v1648_v48, %v312_v15  ;;  %v1651_v59 = vpop.f32.mrb[10].mxu0 }
 0xc54   :  { %v1671_v26 = vadd.f32 %v1655_v49, %v313_v16  ;;  %v1672_v57 = vadd.f32 %v1656_v50, %v314_v63  ;;  %v1673_v43 = vadd.f32 %v1657_v19, %v315_v21  ;;  %v1674_v47 = vadd.f32 %v1658_v36, %v316_v34  ;;  %v3057_v31 = vpop.f32.mrb[11].mxu0 }
 0xc55   :  { %v1675_v29 = vadd.f32 %v1659_v55, %v317_v8  ;;  %v1676_v12 = vadd.f32 %v1660_v35, %v318_v27  ;;  %v1677_v33 = vadd.f32 %v1661_v17, %v319_v6  ;;  %3367 = vtanh.f32 %v1670_v24 }
 0xc56   :  { %3369 = vtanh.f32 %v1671_v26  ;;  %v2936_v44 = vmul.f32 -1.442695, %v1670_v24  ;;  %v2937_v46 = vmul.f32 -1.442695, %v1671_v26  ;;  %v2938_v3 = vmul.f32 -1.442695, %v1672_v57 }
 0xc57   :  { %3371 = vtanh.f32 %v1672_v57  ;;  %v2940_v25 = vmul.f32 -1.442695, %v1674_v47  ;;  %v2939_v54 = vmul.f32 -1.442695, %v1673_v43  ;;  %v2942_v45 = vmul.f32 -1.442695, %v1676_v12 }
 0xc58   :  { %3373 = vtanh.f32 %v1674_v47  ;;  %v2941_v51 = vmul.f32 -1.442695, %v1675_v29  ;;  %v2943_v58 = vmul.f32 -1.442695, %v1677_v33 }
 0xc59   :  { %3375 = vtanh.f32 %v1673_v43 }
 0xc5a   :  { %3377 = vtanh.f32 %v1676_v12 }
 0xc5b   :  { %3379 = vtanh.f32 %v1675_v29 }
 0xc5c   :  { %3381 = vtanh.f32 %v1677_v33 }
 0xc5d   :  { %3383 = vpow2.f32 %v2936_v44 }
 0xc5e   :  { %3385 = vpow2.f32 %v2937_v46 }
 0xc5f   :  { %v3368_v5 = vpop.eup %3367  ;;  %3387 = vpow2.f32 %v2938_v3 }
 0xc60   :  { %1750 = vrot.lane.b32.xlu0 %v3368_v5, %s3651_s0  ;;  %v3370_v4 = vpop.eup %3369  ;;  %3389 = vpow2.f32 %v2940_v25 }
 0xc61   :  { %v3372_v2 = vpop.eup %3371  ;;  %3391 = vpow2.f32 %v2939_v54 }
 0xc62   :  { %1754 = vrot.lane.b32.xlu1 %v3372_v2, %s3651_s0  ;;  %v3374_v9 = vpop.eup %3373  ;;  %3393 = vpow2.f32 %v2942_v45 }
 0xc63   :  { %v3376_v37 = vpop.eup %3375 }
 0xc64   :  { %1752 = vrot.lane.b32.xlu0 %v3370_v4, %s3651_s0  ;;  %v3378_v22 = vpop.eup %3377 }
 0xc65   :  { %v3380_v23 = vpop.eup %3379 }
 0xc66   :  { %1756 = vrot.lane.b32.xlu1 %v3376_v37, %s3651_s0  ;;  %v3382_v42 = vpop.eup %3381 }
 0xc67   :  { %v3384_v40 = vpop.eup %3383 }
 0xc68   :  { %1758 = vrot.lane.b32.xlu0 %v3374_v9, %s3651_s0  ;;  %v1702_v52 = vadd.f32 1.0, %v3384_v40  ;;  %v3386_v61 = vpop.eup %3385 }
 0xc69   :  { %v3388_v15 = vpop.eup %3387  ;;  %v1703_v16 = vadd.f32 1.0, %v3386_v61 }
 0xc6a   :  { %1760 = vrot.lane.b32.xlu1 %v3380_v23, %s3651_s0  ;;  %3395 = vrcp.f32 %v1702_v52  ;;  %v3390_v63 = vpop.eup %3389  ;;  %v1704_v21 = vadd.f32 1.0, %v3388_v15 }
 0xc6b   :  { %3397 = vpow2.f32 %v2941_v51  ;;  %v3392_v34 = vpop.eup %3391  ;;  %v1706_v27 = vadd.f32 1.0, %v3390_v63 }
 0xc6c   :  { %1762 = vrot.lane.b32.xlu0 %v3378_v22, %s3651_s0  ;;  %3399 = vpow2.f32 %v2943_v58  ;;  %v3394_v8 = vpop.eup %3393  ;;  %v1705_v49 = vadd.f32 1.0, %v3392_v34 }
 0xc6d   :  { %3401 = vrcp.f32 %v1703_v16  ;;  %v1708_v36 = vadd.f32 1.0, %v3394_v8 }
 0xc6e   :  { %1764 = vrot.lane.b32.xlu1 %v3382_v42, %s3651_s0  ;;  %3403 = vrcp.f32 %v1704_v21 }
 0xc6f   :  { %3405 = vrcp.f32 %v1706_v27 }
 0xc70   :  { %3407 = vrcp.f32 %v1705_v49 }
 0xc71   :  { %3409 = vrcp.f32 %v1708_v36 }
 0xc74   :  { %v4269_v6 = vpop.eup %3395 }
 0xc75   :  { %v3398_v50 = vpop.eup %3397  ;;  %v1734_v3 = vmul.f32 %v4269_v6, %v4187_v11 }
 0xc76   :  { %v1707_v53 = vadd.f32 1.0, %v3398_v50  ;;  %v3400_v55 = vpop.eup %3399 }
 0xc77   :  { %v1709_v35 = vadd.f32 1.0, %v3400_v55  ;;  %v4273_v17 = vpop.eup %3401 }
 0xc78   :  { %3411 = vrcp.f32 %v1707_v53  ;;  %v4275_v59 = vpop.eup %3403  ;;  %v1735_v54 = vmul.f32 %v4273_v17, %v4194_v28 }
 0xc79   :  { %3413 = vrcp.f32 %v1709_v35  ;;  %v4280_v47 = vpop.eup %3405  ;;  %v1736_v45 = vmul.f32 %v4275_v59, %v4196_v30 }
 0xc7a   :  { %v4283_v29 = vpop.eup %3407  ;;  %v1738_v11 = vmul.f32 %v4280_v47, %v4204_v0 }
 0xc7b   :  { %v4288_v4 = vpop.eup %3409  ;;  %v1737_v28 = vmul.f32 %v4283_v29, %v4207_v32 }
 0xc7c   :  { %v1740_v34 = vmul.f32 %v4288_v4, %v4215_v39 }
 0xc82   :  { %v4291_v9 = vpop.eup %3411 }
 0xc83   :  { %v4297_v42 = vpop.eup %3413  ;;  %v1739_v0 = vmul.f32 %v4291_v9, %v4217_v20 }
 0xc84   :  { %v1741_v49 = vmul.f32 %v4297_v42, %v4223_v41 }
 0xcd2   :  { %v1751_v48 = vpop.permute.xlu0 %1750 }
 0xcd3   :  { %v1774_v19 = vmul.f32 %v4269_v6, %v1751_v48 }
 0xcd4   :  { %v1755_v26 = vpop.permute.xlu1 %1754 }
 0xcd5   :  { %1790 = vrot.lane.b32.xlu0 %v1774_v19, %s3652_s7  ;;  %v1776_v43 = vmul.f32 %v4275_v59, %v1755_v26 }
 0xcd6   :  { %v1753_v24 = vpop.permute.xlu0 %1752 }
 0xcd7   :  { %v1775_v57 = vmul.f32 %v4273_v17, %v1753_v24  ;;  %1794 = vrot.lane.b32.xlu1 %v1776_v43, %s3652_s7 }
 0xcd8   :  { %v1757_v12 = vpop.permute.xlu1 %1756 }
 0xcd9   :  { %1792 = vrot.lane.b32.xlu0 %v1775_v57, %s3652_s7  ;;  %v1777_v5 = vmul.f32 %v4283_v29, %v1757_v12 }
 0xcda   :  { %v1759_v31 = vpop.permute.xlu0 %1758 }
 0xcdb   :  { %v1778_v33 = vmul.f32 %v4280_v47, %v1759_v31  ;;  %1796 = vrot.lane.b32.xlu1 %v1777_v5, %s3652_s7 }
 0xcdc   :  { %v1761_v37 = vpop.permute.xlu1 %1760 }
 0xcdd   :  { %1798 = vrot.lane.b32.xlu0 %v1778_v33, %s3652_s7  ;;  %v1779_v23 = vmul.f32 %v4291_v9, %v1761_v37 }
 0xcde   :  { %v1763_v2 = vpop.permute.xlu0 %1762 }
 0xcdf   :  { %v1780_v22 = vmul.f32 %v4288_v4, %v1763_v2  ;;  %1800 = vrot.lane.b32.xlu1 %v1779_v23, %s3652_s7 }
 0xce0   :  { %v1765_v44 = vpop.permute.xlu1 %1764 }
 0xce1   :  { %1802 = vrot.lane.b32.xlu0 %v1780_v22, %s3652_s7  ;;  %v1781_v46 = vmul.f32 %v4297_v42, %v1765_v44 }
 0xce3   :  { %1804 = vrot.lane.b32.xlu1 %v1781_v46, %s3652_s7 }
 0xd47   :  { %v1791_v25 = vpop.permute.xlu0 %1790 }
 0xd48   :  { %v4303_v40 = vadd.f32 %v1791_v25, %v1734_v3 }
 0xd49   :  { %v1795_v51 = vpop.permute.xlu1 %1794 }
 0xd4a   :  { %3415 = vtanh.f32 %v4303_v40  ;;  %v4312_v61 = vadd.f32 %v1795_v51, %v1736_v45 }
 0xd4b   :  { %v1793_v52 = vpop.permute.xlu0 %1792 }
 0xd4c   :  { %v4310_v58 = vadd.f32 %v1793_v52, %v1735_v54 }
 0xd4d   :  { %v1797_v63 = vpop.permute.xlu1 %1796 }
 0xd4e   :  { %3417 = vtanh.f32 %v4310_v58  ;;  %v4323_v21 = vadd.f32 %v1797_v63, %v1737_v28 }
 0xd4f   :  { %3419 = vtanh.f32 %v4312_v61  ;;  %v1799_v16 = vpop.permute.xlu0 %1798 }
 0xd50   :  { %v4320_v30 = vadd.f32 %v1799_v16, %v1738_v11 }
 0xd51   :  { %v1801_v32 = vpop.permute.xlu1 %1800 }
 0xd52   :  { %3421 = vtanh.f32 %v4320_v30  ;;  %v4333_v48 = vadd.f32 %v1801_v32, %v1739_v0 }
 0xd53   :  { %3423 = vtanh.f32 %v4323_v21  ;;  %v1803_v8 = vpop.permute.xlu0 %1802 }
 0xd54   :  { %v3416_v15 = vpop.eup %3415  ;;  %v4331_v27 = vadd.f32 %v1803_v8, %v1740_v34 }
 0xd55   :  { %1838 = vrot.lane.b32.xlu0 %v3416_v15, %s3653_s8  ;;  %v1805_v39 = vpop.permute.xlu1 %1804 }
 0xd56   :  { %3425 = vtanh.f32 %v4331_v27  ;;  %v4339_v36 = vadd.f32 %v1805_v39, %v1741_v49 }
 0xd57   :  { %3427 = vtanh.f32 %v4333_v48 }
 0xd58   :  { %v3418_v50 = vpop.eup %3417  ;;  %3429 = vtanh.f32 %v4339_v36 }
 0xd59   :  { %v3420_v19 = vpop.eup %3419  ;;  %1840 = vrot.lane.b32.xlu0 %v3418_v50, %s3653_s8 }
 0xd5a   :  { %1842 = vrot.lane.b32.xlu1 %v3420_v19, %s3653_s8 }
 0xd5c   :  { %v3422_v20 = vpop.eup %3421 }
 0xd5d   :  { %v3424_v53 = vpop.eup %3423  ;;  %1846 = vrot.lane.b32.xlu0 %v3422_v20, %s3653_s8 }
 0xd5e   :  { %1844 = vrot.lane.b32.xlu1 %v3424_v53, %s3653_s8 }
 0xd60   :  { %v3426_v55 = vpop.eup %3425 }
 0xd61   :  { %v3428_v35 = vpop.eup %3427  ;;  %1850 = vrot.lane.b32.xlu0 %v3426_v55, %s3653_s8 }
 0xd62   :  { %1848 = vrot.lane.b32.xlu1 %v3428_v35, %s3653_s8  ;;  %v3430_v41 = vpop.eup %3429 }
 0xd66   :  { %1852 = vrot.lane.b32.xlu1 %v3430_v41, %s3653_s8 }
 0xdc7   :  { %v1839_v24 = vpop.permute.xlu0 %1838 }
 0xdc8   :  { %v1862_v26 = vmul.f32 %v4269_v6, %v1839_v24 }
 0xdca   :  { %v1870_v33 = vpack.c.bf16 %v1862_v26, %v1862_v26 }
 0xdcb   :  { %v1841_v57 = vpop.permute.xlu0 %1840 }
 0xdcc   :  { %v1843_v43 = vpop.permute.xlu1 %1842  ;;  %v1863_v31 = vmul.f32 %v4273_v17, %v1841_v57  ;;  %v1886_v25 = vunpack.c.l.b16 %v1870_v33  ;;  %v332_v33 = vrot.slane %v3792_v10, 5 }
 0xdcd   :  { %v1864_v12 = vmul.f32 %v4275_v59, %v1843_v43  ;;  %v329_v43 = vrot.slane %v3785_v1, 5 }
 0xdce   :  { %v1871_v5 = vpack.c.bf16 %v1863_v31, %v1863_v31  ;;  %v330_v31 = vrot.slane %v3778_v56, 5 }
 0xdcf   :  { %v1872_v2 = vpack.c.bf16 %v1864_v12, %v1864_v12  ;;  %v1847_v37 = vpop.permute.xlu0 %1846  ;;  %v331_v12 = vrot.slane %v3782_v62, 5 }
 0xdd0   :  { %v1887_v22 = vunpack.c.l.b16 %v1871_v5  ;;  %v1845_v23 = vpop.permute.xlu1 %1844  ;;  %v1866_v44 = vmul.f32 %v4280_v47, %v1847_v37  ;;  %v333_v5 = vrot.slane %v3797_v18, 5  ;;  %v335_v37 = vrot.slane %v3794_v13, 5 }
 0xdd1   :  { %v1888_v46 = vunpack.c.l.b16 %v1872_v2  ;;  %v1865_v3 = vmul.f32 %v4283_v29, %v1845_v23  ;;  %v334_v2 = vrot.slane %v3790_v7, 5 }
 0xdd2   :  { %v1894_v54 = vrot.slane %v1887_v22, 7  ;;  %v1874_v6 = vpack.c.bf16 %v1866_v44, %v1866_v44 }
 0xdd3   :  { %v1873_v45 = vpack.c.bf16 %v1865_v3, %v1865_v3  ;;  %v1851_v52 = vpop.permute.xlu0 %1850  ;;  %v1896_v51 = vrot.slane %v1888_v46, 6 }
 0xdd4   :  { %v1895_v17 = vsel %vm688_vm6, %v1894_v54, %v1886_v25  ;;  %v1890_v59 = vunpack.c.l.b16 %v1874_v6  ;;  %v1849_v11 = vpop.permute.xlu1 %1848  ;;  %v1868_v15 = vmul.f32 %v4288_v4, %v1851_v52 }
 0xdd5   :  { %v1889_v28 = vunpack.c.l.b16 %v1873_v45  ;;  %v1867_v16 = vmul.f32 %v4291_v9, %v1849_v11  ;;  %v1897_v47 = vsel %vm691_vm7, %v1896_v51, %v1895_v17 }
 0xdd6   :  { %v1900_v63 = vrot.slane %v1890_v59, 4  ;;  %v1876_v34 = vpack.c.bf16 %v1868_v15, %v1868_v15 }
 0xdd7   :  { %v1898_v29 = vrot.slane %v1889_v28, 5  ;;  %v1875_v0 = vpack.c.bf16 %v1867_v16, %v1867_v16 }
 0xdd8   :  { %v1892_v8 = vunpack.c.l.b16 %v1876_v34  ;;  %v1853_v32 = vpop.permute.xlu1 %1852 }
 0xdd9   :  { %v1899_v49 = vsel %vm694_vm8, %v1898_v29, %v1897_v47  ;;  %v1891_v50 = vunpack.c.l.b16 %v1875_v0  ;;  %v1869_v39 = vmul.f32 %v4297_v42, %v1853_v32  ;;  %v328_v42 = vrot.slane %v3780_v60, 5 }
 0xdda   :  { %v1901_v19 = vsel %vm697_vm9, %v1900_v63, %v1899_v49  ;;  %v1904_v20 = vrot.slane %v1892_v8, 2 }
 0xddb   :  { %v1902_v4 = vrot.slane %v1891_v50, 3  ;;  %v1877_v53 = vpack.c.bf16 %v1869_v39, %v1869_v39 }
 0xddd   :  { %v1903_v9 = vsel %vm700_vm10, %v1902_v4, %v1901_v19  ;;  %v1893_v55 = vunpack.c.l.b16 %v1877_v53 }
 0xdde   :  { %v1905_v35 = vsel %vm703_vm11, %v1904_v20, %v1903_v9 }
 0xddf   :  { %v1906_v41 = vrot.slane %v1893_v55, 1 }
 0xde1   :  { %v1907_v24 = vsel %vm706_vm12, %v1906_v41, %v1905_v35 }
 0xde2   :  { %v1908_v26 = vpack.c.b16 %v1907_v24, %v1907_v24 }
 0xde4   :  { %1909 = vrot.lane.b32.xlu0 %v1908_v26, %s3654_s9 }
 0xe56   :  { %v1910_v57 = vpop.permute.xlu0 %1909 }
 0xe57   :  { %3061 = vmatmul.mubr.msk.bf16.vlgmr.msra.gmra.mrb[16].mxu1 %vm403_vm13, %v1910_v57 }
 0xe58   :  { %3071 = vmatpush3.bf16.msra.mxu1 %v3739_v38  ;;  %3072 = vmatprep.mubr.msk.bf16.mxu1 %vm3649_vm3, %v3648_v14 }
 0xf2a   :  { %v1948_v38 = vpop.f32.mrb[16].mxu1 }
 0xf2b   :  { %v1955_v22 = vrot.slane %v1948_v38, 1  ;;  %v1956_v23 = vrot.slane %v1948_v38, 2  ;;  %v1957_v44 = vrot.slane %v1948_v38, 3  ;;  %v1958_v46 = vrot.slane %v1948_v38, 4  ;;  %v3062_v3 = vpop.f32.mrb[17].mxu1 }
 0xf2c   :  { %v1959_v25 = vrot.slane %v1948_v38, 5  ;;  %v1960_v54 = vrot.slane %v1948_v38, 6  ;;  %v1961_v6 = vrot.slane %v1948_v38, 7  ;;  %v1970_v45 = vadd.f32 %v1948_v38, %v328_v42  ;;  %v1951_v52 = vpop.f32.mrb[18].mxu1 }
 0xf2d   :  { %v1971_v51 = vadd.f32 %v1955_v22, %v329_v43  ;;  %v1972_v17 = vadd.f32 %v1956_v23, %v330_v31  ;;  %v1973_v59 = vadd.f32 %v1957_v44, %v331_v12  ;;  %v1974_v11 = vadd.f32 %v1958_v46, %v332_v33  ;;  %v3063_v15 = vpop.f32.mrb[19].mxu1 }
 0xf2e   :  { %v1975_v28 = vadd.f32 %v1959_v25, %v333_v5  ;;  %v1976_v16 = vadd.f32 %v1960_v54, %v334_v2  ;;  %v1977_v47 = vadd.f32 %v1961_v6, %v335_v37  ;;  %3431 = vtanh.f32 %v1970_v45 }
 0xf2f   :  { %3433 = vtanh.f32 %v1971_v51  ;;  %v2945_v39 = vmul.f32 -1.442695, %v1970_v45  ;;  %v2946_v19 = vmul.f32 -1.442695, %v1971_v51  ;;  %v2947_v20 = vmul.f32 -1.442695, %v1972_v17 }
 0xf30   :  { %3435 = vtanh.f32 %v1972_v17  ;;  %v2949_v4 = vmul.f32 -1.442695, %v1974_v11  ;;  %v2948_v9 = vmul.f32 -1.442695, %v1973_v59  ;;  %v2951_v55 = vmul.f32 -1.442695, %v1976_v16 }
 0xf31   :  { %3437 = vtanh.f32 %v1974_v11  ;;  %v2950_v41 = vmul.f32 -1.442695, %v1975_v28  ;;  %v2952_v24 = vmul.f32 -1.442695, %v1977_v47 }
 0xf32   :  { %3439 = vtanh.f32 %v1973_v59 }
 0xf33   :  { %3441 = vtanh.f32 %v1976_v16 }
 0xf34   :  { %3443 = vtanh.f32 %v1975_v28 }
 0xf35   :  { %3445 = vtanh.f32 %v1977_v47 }
 0xf36   :  { %3447 = vpow2.f32 %v2945_v39 }
 0xf37   :  { %3449 = vpow2.f32 %v2946_v19 }
 0xf38   :  { %v3432_v63 = vpop.eup %3431  ;;  %3451 = vpow2.f32 %v2947_v20 }
 0xf39   :  { %2050 = vrot.lane.b32.xlu1 %v3432_v63, %s3651_s0  ;;  %v3434_v34 = vpop.eup %3433  ;;  %3453 = vpow2.f32 %v2949_v4 }
 0xf3a   :  { %v3436_v29 = vpop.eup %3435  ;;  %3455 = vpow2.f32 %v2948_v9 }
 0xf3b   :  { %2054 = vrot.lane.b32.xlu0 %v3436_v29, %s3651_s0  ;;  %v3438_v0 = vpop.eup %3437  ;;  %3457 = vpow2.f32 %v2951_v55 }
 0xf3c   :  { %v3440_v8 = vpop.eup %3439 }
 0xf3d   :  { %2052 = vrot.lane.b32.xlu1 %v3434_v34, %s3651_s0  ;;  %v3442_v32 = vpop.eup %3441 }
 0xf3e   :  { %v3444_v49 = vpop.eup %3443 }
 0xf3f   :  { %2056 = vrot.lane.b32.xlu0 %v3440_v8, %s3651_s0  ;;  %v3446_v50 = vpop.eup %3445 }
 0xf40   :  { %v3448_v53 = vpop.eup %3447 }
 0xf41   :  { %2058 = vrot.lane.b32.xlu1 %v3438_v0, %s3651_s0  ;;  %v2002_v35 = vadd.f32 1.0, %v3448_v53  ;;  %v3450_v26 = vpop.eup %3449 }
 0xf42   :  { %v3452_v57 = vpop.eup %3451  ;;  %v2003_v42 = vadd.f32 1.0, %v3450_v26 }
 0xf43   :  { %2060 = vrot.lane.b32.xlu0 %v3444_v49, %s3651_s0  ;;  %3459 = vrcp.f32 %v2002_v35  ;;  %v3454_v43 = vpop.eup %3453  ;;  %v2004_v31 = vadd.f32 1.0, %v3452_v57 }
 0xf44   :  { %3461 = vpow2.f32 %v2950_v41  ;;  %v3456_v12 = vpop.eup %3455  ;;  %v2006_v5 = vadd.f32 1.0, %v3454_v43 }
 0xf45   :  { %2062 = vrot.lane.b32.xlu1 %v3442_v32, %s3651_s0  ;;  %3463 = vpow2.f32 %v2952_v24  ;;  %v3458_v33 = vpop.eup %3457  ;;  %v2005_v38 = vadd.f32 1.0, %v3456_v12 }
 0xf46   :  { %3465 = vrcp.f32 %v2003_v42  ;;  %v2008_v44 = vadd.f32 1.0, %v3458_v33 }
 0xf47   :  { %2064 = vrot.lane.b32.xlu0 %v3446_v50, %s3651_s0  ;;  %3467 = vrcp.f32 %v2004_v31 }
 0xf48   :  { %3469 = vrcp.f32 %v2006_v5 }
 0xf49   :  { %3471 = vrcp.f32 %v2005_v38 }
 0xf4a   :  { %3473 = vrcp.f32 %v2008_v44 }
 0xf4d   :  { %v4385_v2 = vpop.eup %3459 }
 0xf4e   :  { %v3462_v22 = vpop.eup %3461  ;;  %v2034_v19 = vmul.f32 %v4385_v2, %v4303_v40 }
 0xf4f   :  { %v2007_v46 = vadd.f32 1.0, %v3462_v22  ;;  %v3464_v3 = vpop.eup %3463 }
 0xf50   :  { %v2009_v25 = vadd.f32 1.0, %v3464_v3  ;;  %v4389_v54 = vpop.eup %3465 }
 0xf51   :  { %3475 = vrcp.f32 %v2007_v46  ;;  %v4391_v45 = vpop.eup %3467  ;;  %v2035_v53 = vmul.f32 %v4389_v54, %v4310_v58 }
 0xf52   :  { %3477 = vrcp.f32 %v2009_v25  ;;  %v4396_v59 = vpop.eup %3469  ;;  %v2036_v9 = vmul.f32 %v4391_v45, %v4312_v61 }
 0xf53   :  { %v4399_v15 = vpop.eup %3471  ;;  %v2038_v40 = vmul.f32 %v4396_v59, %v4320_v30 }
 0xf54   :  { %v4404_v63 = vpop.eup %3473  ;;  %v2037_v58 = vmul.f32 %v4399_v15, %v4323_v21 }
 0xf55   :  { %v2040_v31 = vmul.f32 %v4404_v63, %v4331_v27 }
 0xf5b   :  { %v4407_v29 = vpop.eup %3475 }
 0xf5c   :  { %v4413_v49 = vpop.eup %3477  ;;  %v2039_v30 = vmul.f32 %v4407_v29, %v4333_v48 }
 0xfab   :  { %v2051_v37 = vpop.permute.xlu1 %2050 }
 0xfac   :  { %v2074_v23 = vmul.f32 %v4385_v2, %v2051_v37  ;;  %v2041_v37 = vmul.f32 %v4413_v49, %v4339_v36 }
 0xfad   :  { %v2055_v52 = vpop.permute.xlu0 %2054 }
 0xfae   :  { %2090 = vrot.lane.b32.xlu1 %v2074_v23, %s3652_s7  ;;  %v2076_v17 = vmul.f32 %v4391_v45, %v2055_v52 }
 0xfaf   :  { %v2053_v6 = vpop.permute.xlu1 %2052 }
 0xfb0   :  { %v2075_v51 = vmul.f32 %v4389_v54, %v2053_v6  ;;  %2094 = vrot.lane.b32.xlu0 %v2076_v17, %s3652_s7 }
 0xfb1   :  { %v2057_v28 = vpop.permute.xlu0 %2056 }
 0xfb2   :  { %2092 = vrot.lane.b32.xlu1 %v2075_v51, %s3652_s7  ;;  %v2077_v47 = vmul.f32 %v4399_v15, %v2057_v28 }
 0xfb3   :  { %v2059_v11 = vpop.permute.xlu1 %2058 }
 0xfb4   :  { %v2078_v16 = vmul.f32 %v4396_v59, %v2059_v11  ;;  %2096 = vrot.lane.b32.xlu0 %v2077_v47, %s3652_s7 }
 0xfb5   :  { %v2061_v0 = vpop.permute.xlu0 %2060 }
 0xfb6   :  { %2098 = vrot.lane.b32.xlu1 %v2078_v16, %s3652_s7  ;;  %v2079_v32 = vmul.f32 %v4407_v29, %v2061_v0 }
 0xfb7   :  { %v2063_v34 = vpop.permute.xlu1 %2062 }
 0xfb8   :  { %v2080_v8 = vmul.f32 %v4404_v63, %v2063_v34  ;;  %2100 = vrot.lane.b32.xlu0 %v2079_v32, %s3652_s7 }
 0xfb9   :  { %v2065_v50 = vpop.permute.xlu0 %2064 }
 0xfba   :  { %2102 = vrot.lane.b32.xlu1 %v2080_v8, %s3652_s7  ;;  %v2081_v39 = vmul.f32 %v4413_v49, %v2065_v50 }
 0xfbc   :  { %2104 = vrot.lane.b32.xlu0 %v2081_v39, %s3652_s7 }
0x1020   :  { %v2091_v20 = vpop.permute.xlu1 %2090 }
0x1021   :  { %v4419_v4 = vadd.f32 %v2091_v20, %v2034_v19 }
0x1022   :  { %v2095_v35 = vpop.permute.xlu0 %2094 }
0x1023   :  { %3479 = vtanh.f32 %v4419_v4  ;;  %v4428_v24 = vadd.f32 %v2095_v35, %v2036_v9 }
0x1024   :  { %v2093_v55 = vpop.permute.xlu1 %2092 }
0x1025   :  { %v4426_v41 = vadd.f32 %v2093_v55, %v2035_v53 }
0x1026   :  { %v2097_v42 = vpop.permute.xlu0 %2096 }
0x1027   :  { %3481 = vtanh.f32 %v4426_v41  ;;  %v4439_v43 = vadd.f32 %v2097_v42, %v2037_v58 }
0x1028   :  { %3483 = vtanh.f32 %v4428_v24  ;;  %v2099_v57 = vpop.permute.xlu1 %2098 }
0x1029   :  { %v4436_v61 = vadd.f32 %v2099_v57, %v2038_v40 }
0x102a   :  { %v2101_v21 = vpop.permute.xlu0 %2100 }
0x102b   :  { %3485 = vtanh.f32 %v4436_v61  ;;  %v4449_v5 = vadd.f32 %v2101_v21, %v2039_v30 }
0x102c   :  { %3487 = vtanh.f32 %v4439_v43  ;;  %v2103_v12 = vpop.permute.xlu1 %2102 }
0x102d   :  { %v3480_v26 = vpop.eup %3479  ;;  %v4447_v33 = vadd.f32 %v2103_v12, %v2040_v31 }
0x102e   :  { %2138 = vrot.lane.b32.xlu1 %v3480_v26, %s3653_s8  ;;  %v2105_v27 = vpop.permute.xlu0 %2104 }
0x102f   :  { %3489 = vtanh.f32 %v4447_v33  ;;  %v4455_v23 = vadd.f32 %v2105_v27, %v2041_v37 }
0x1030   :  { %3491 = vtanh.f32 %v4449_v5 }
0x1031   :  { %v3482_v38 = vpop.eup %3481  ;;  %3493 = vtanh.f32 %v4455_v23 }
0x1032   :  { %v3484_v22 = vpop.eup %3483  ;;  %2140 = vrot.lane.b32.xlu1 %v3482_v38, %s3653_s8 }
0x1033   :  { %2142 = vrot.lane.b32.xlu0 %v3484_v22, %s3653_s8 }
0x1035   :  { %v3486_v48 = vpop.eup %3485 }
0x1036   :  { %v3488_v44 = vpop.eup %3487  ;;  %2146 = vrot.lane.b32.xlu1 %v3486_v48, %s3653_s8 }
0x1037   :  { %2144 = vrot.lane.b32.xlu0 %v3488_v44, %s3653_s8 }
0x1039   :  { %v3490_v46 = vpop.eup %3489 }
0x103a   :  { %v3492_v3 = vpop.eup %3491  ;;  %2150 = vrot.lane.b32.xlu1 %v3490_v46, %s3653_s8 }
0x103b   :  { %2148 = vrot.lane.b32.xlu0 %v3492_v3, %s3653_s8  ;;  %v3494_v36 = vpop.eup %3493 }
0x103f   :  { %2152 = vrot.lane.b32.xlu0 %v3494_v36, %s3653_s8 }
0x10a0   :  { %v2139_v25 = vpop.permute.xlu1 %2138 }
0x10a1   :  { %v2162_v6 = vmul.f32 %v4385_v2, %v2139_v25 }
0x10a3   :  { %v2170_v28 = vpack.c.bf16 %v2162_v6, %v2162_v6 }
0x10a4   :  { %v2141_v52 = vpop.permute.xlu1 %2140 }
0x10a5   :  { %v2143_v51 = vpop.permute.xlu0 %2142  ;;  %v2163_v17 = vmul.f32 %v4389_v54, %v2141_v52  ;;  %v2186_v19 = vunpack.c.l.b16 %v2170_v28  ;;  %v345_v52 = vrot.slane %v3785_v1, 6  ;;  %v349_v28 = vrot.slane %v3797_v18, 6 }
0x10a6   :  { %v2164_v11 = vmul.f32 %v4391_v45, %v2143_v51  ;;  %v346_v51 = vrot.slane %v3778_v56, 6 }
0x10a7   :  { %v2171_v16 = vpack.c.bf16 %v2163_v17, %v2163_v17  ;;  %v347_v17 = vrot.slane %v3782_v62, 6 }
0x10a8   :  { %v2172_v47 = vpack.c.bf16 %v2164_v11, %v2164_v11  ;;  %v2147_v34 = vpop.permute.xlu1 %2146  ;;  %v348_v11 = vrot.slane %v3792_v10, 6 }
0x10a9   :  { %v2187_v0 = vunpack.c.l.b16 %v2171_v16  ;;  %v2145_v8 = vpop.permute.xlu0 %2144  ;;  %v2166_v32 = vmul.f32 %v4396_v59, %v2147_v34  ;;  %v350_v16 = vrot.slane %v3790_v7, 6 }
0x10aa   :  { %v2188_v50 = vunpack.c.l.b16 %v2172_v47  ;;  %v2165_v39 = vmul.f32 %v4399_v15, %v2145_v8  ;;  %v351_v47 = vrot.slane %v3794_v13, 6 }
0x10ab   :  { %v2194_v20 = vrot.slane %v2187_v0, 7  ;;  %v2174_v2 = vpack.c.bf16 %v2166_v32, %v2166_v32 }
0x10ac   :  { %v2173_v53 = vpack.c.bf16 %v2165_v39, %v2165_v39  ;;  %v2151_v9 = vpop.permute.xlu1 %2150  ;;  %v2196_v55 = vrot.slane %v2188_v50, 6 }
0x10ad   :  { %v2195_v54 = vsel %vm688_vm6, %v2194_v20, %v2186_v19  ;;  %v2190_v45 = vunpack.c.l.b16 %v2174_v2  ;;  %v2149_v35 = vpop.permute.xlu0 %2148  ;;  %v2168_v40 = vmul.f32 %v4404_v63, %v2151_v9 }
0x10ae   :  { %v2189_v26 = vunpack.c.l.b16 %v2173_v53  ;;  %v2167_v58 = vmul.f32 %v4407_v29, %v2149_v35  ;;  %v2197_v59 = vsel %vm691_vm7, %v2196_v55, %v2195_v54 }
0x10af   :  { %v2200_v57 = vrot.slane %v2190_v45, 4  ;;  %v2176_v42 = vpack.c.bf16 %v2168_v40, %v2168_v40 }
0x10b0   :  { %v2198_v15 = vrot.slane %v2189_v26, 5  ;;  %v2175_v31 = vpack.c.bf16 %v2167_v58, %v2167_v58 }
0x10b1   :  { %v2192_v30 = vunpack.c.l.b16 %v2176_v42  ;;  %v2153_v12 = vpop.permute.xlu0 %2152 }
0x10b2   :  { %v2199_v21 = vsel %vm694_vm8, %v2198_v15, %v2197_v59  ;;  %v2191_v37 = vunpack.c.l.b16 %v2175_v31  ;;  %v2169_v38 = vmul.f32 %v4413_v49, %v2153_v12  ;;  %v344_v49 = vrot.slane %v3780_v60, 6 }
0x10b3   :  { %v2201_v27 = vsel %vm697_vm9, %v2200_v57, %v2199_v21  ;;  %v2204_v22 = vrot.slane %v2192_v30, 2 }
0x10b4   :  { %v2202_v63 = vrot.slane %v2191_v37, 3  ;;  %v2177_v48 = vpack.c.bf16 %v2169_v38, %v2169_v38 }
0x10b6   :  { %v2203_v29 = vsel %vm700_vm10, %v2202_v63, %v2201_v27  ;;  %v2193_v44 = vunpack.c.l.b16 %v2177_v48 }
0x10b7   :  { %v2205_v46 = vsel %vm703_vm11, %v2204_v22, %v2203_v29 }
0x10b8   :  { %v2206_v3 = vrot.slane %v2193_v44, 1 }
0x10ba   :  { %v2207_v36 = vsel %vm706_vm12, %v2206_v3, %v2205_v46 }
0x10bb   :  { %v2208_v25 = vpack.c.b16 %v2207_v36, %v2207_v36 }
0x10bd   :  { %2209 = vrot.lane.b32.xlu1 %v2208_v25, %s3654_s9 }
0x112f   :  { %v2210_v6 = vpop.permute.xlu1 %2209 }
0x1130   :  { %3067 = vmatmul.mubr.msk.bf16.vlgmr.msra.gmra.mrb[12].mxu0 %vm403_vm13, %v2210_v6 }
0x1131   :  { %3080 = vmatprep.mubr.msk.f32.mxu0 %vm3649_vm3, %v3648_v14 }
0x1203   :  { %v2248_v34 = vpop.f32.mrb[12].mxu0 }
0x1204   :  { %v2255_v0 = vrot.slane %v2248_v34, 1  ;;  %v2256_v8 = vrot.slane %v2248_v34, 2  ;;  %v2257_v14 = vrot.slane %v2248_v34, 3  ;;  %v2258_v32 = vrot.slane %v2248_v34, 4  ;;  %v3068_v50 = vpop.f32.mrb[13].mxu0 }
0x1205   :  { %v2259_v39 = vrot.slane %v2248_v34, 5  ;;  %v2260_v19 = vrot.slane %v2248_v34, 6  ;;  %v2261_v20 = vrot.slane %v2248_v34, 7  ;;  %v2270_v2 = vadd.f32 %v2248_v34, %v344_v49  ;;  %v2251_v53 = vpop.f32.mrb[14].mxu0 }
0x1206   :  { %v2271_v9 = vadd.f32 %v2255_v0, %v345_v52  ;;  %v2272_v55 = vadd.f32 %v2256_v8, %v346_v51  ;;  %v2273_v54 = vadd.f32 %v2257_v14, %v347_v17  ;;  %v2274_v45 = vadd.f32 %v2258_v32, %v348_v11  ;;  %v3069_v35 = vpop.f32.mrb[15].mxu0 }
0x1207   :  { %v2275_v40 = vadd.f32 %v2259_v39, %v349_v28  ;;  %v2276_v26 = vadd.f32 %v2260_v19, %v350_v16  ;;  %v2277_v58 = vadd.f32 %v2261_v20, %v351_v47  ;;  %3495 = vtanh.f32 %v2270_v2 }
0x1208   :  { %3497 = vtanh.f32 %v2271_v9  ;;  %v2954_v37 = vmul.f32 -1.442695, %v2270_v2  ;;  %v2955_v38 = vmul.f32 -1.442695, %v2271_v9  ;;  %v2956_v27 = vmul.f32 -1.442695, %v2272_v55 }
0x1209   :  { %3499 = vtanh.f32 %v2272_v55  ;;  %v2958_v22 = vmul.f32 -1.442695, %v2274_v45  ;;  %v2957_v48 = vmul.f32 -1.442695, %v2273_v54  ;;  %v2960_v29 = vmul.f32 -1.442695, %v2276_v26 }
0x120a   :  { %3501 = vtanh.f32 %v2274_v45  ;;  %v2959_v46 = vmul.f32 -1.442695, %v2275_v40  ;;  %v2961_v3 = vmul.f32 -1.442695, %v2277_v58 }
0x120b   :  { %3503 = vtanh.f32 %v2273_v54 }
0x120c   :  { %3505 = vtanh.f32 %v2276_v26 }
0x120d   :  { %3507 = vtanh.f32 %v2275_v40 }
0x120e   :  { %3509 = vtanh.f32 %v2277_v58 }
0x120f   :  { %3511 = vpow2.f32 %v2954_v37 }
0x1210   :  { %3513 = vpow2.f32 %v2955_v38 }
0x1211   :  { %v3496_v59 = vpop.eup %3495  ;;  %3515 = vpow2.f32 %v2956_v27 }
0x1212   :  { %2350 = vrot.lane.b32.xlu0 %v3496_v59, %s3651_s0  ;;  %v3498_v57 = vpop.eup %3497  ;;  %3517 = vpow2.f32 %v2958_v22 }
0x1213   :  { %v3500_v42 = vpop.eup %3499  ;;  %3519 = vpow2.f32 %v2957_v48 }
0x1214   :  { %2354 = vrot.lane.b32.xlu1 %v3500_v42, %s3651_s0  ;;  %v3502_v15 = vpop.eup %3501  ;;  %3521 = vpow2.f32 %v2960_v29 }
0x1215   :  { %v3504_v31 = vpop.eup %3503 }
0x1216   :  { %2352 = vrot.lane.b32.xlu0 %v3498_v57, %s3651_s0  ;;  %v3506_v30 = vpop.eup %3505 }
0x1217   :  { %v3508_v12 = vpop.eup %3507 }
0x1218   :  { %2356 = vrot.lane.b32.xlu1 %v3504_v31, %s3651_s0  ;;  %v3510_v21 = vpop.eup %3509 }
0x1219   :  { %v3512_v63 = vpop.eup %3511 }
0x121a   :  { %2358 = vrot.lane.b32.xlu0 %v3502_v15, %s3651_s0  ;;  %v2302_v44 = vadd.f32 1.0, %v3512_v63  ;;  %v3514_v36 = vpop.eup %3513 }
0x121b   :  { %v3516_v25 = vpop.eup %3515  ;;  %v2303_v6 = vadd.f32 1.0, %v3514_v36 }
0x121c   :  { %2360 = vrot.lane.b32.xlu1 %v3508_v12, %s3651_s0  ;;  %3523 = vrcp.f32 %v2302_v44  ;;  %v3518_v49 = vpop.eup %3517  ;;  %v2304_v52 = vadd.f32 1.0, %v3516_v25 }
0x121d   :  { %3525 = vpow2.f32 %v2959_v46  ;;  %v3520_v51 = vpop.eup %3519  ;;  %v2306_v11 = vadd.f32 1.0, %v3518_v49 }
0x121e   :  { %2362 = vrot.lane.b32.xlu0 %v3506_v30, %s3651_s0  ;;  %3527 = vpow2.f32 %v2961_v3  ;;  %v3522_v17 = vpop.eup %3521  ;;  %v2305_v47 = vadd.f32 1.0, %v3520_v51 }
0x121f   :  { %3529 = vrcp.f32 %v2303_v6  ;;  %v2308_v8 = vadd.f32 1.0, %v3522_v17 }
0x1220   :  { %2364 = vrot.lane.b32.xlu1 %v3510_v21, %s3651_s0  ;;  %3531 = vrcp.f32 %v2304_v52 }
0x1221   :  { %3533 = vrcp.f32 %v2306_v11 }
0x1222   :  { %3535 = vrcp.f32 %v2305_v47 }
0x1223   :  { %3537 = vrcp.f32 %v2308_v8 }
0x1226   :  { %v4500_v28 = vpop.eup %3523 }
0x1227   :  { %v3526_v34 = vpop.eup %3525  ;;  %v2334_v37 = vmul.f32 %v4500_v28, %v4419_v4 }
0x1228   :  { %v2307_v14 = vadd.f32 1.0, %v3526_v34  ;;  %v3528_v32 = vpop.eup %3527 }
0x1229   :  { %v2309_v50 = vadd.f32 1.0, %v3528_v32  ;;  %v4504_v39 = vpop.eup %3529 }
0x122a   :  { %3539 = vrcp.f32 %v2307_v14  ;;  %v4506_v20 = vpop.eup %3531  ;;  %v2335_v22 = vmul.f32 %v4504_v39, %v4426_v41 }
0x122b   :  { %3541 = vrcp.f32 %v2309_v50  ;;  %v4511_v55 = vpop.eup %3533  ;;  %v2336_v63 = vmul.f32 %v4506_v20, %v4428_v24 }
0x122c   :  { %v4514_v45 = vpop.eup %3535  ;;  %v2338_v4 = vmul.f32 %v4511_v55, %v4436_v61 }
0x122d   :  { %v4519_v58 = vpop.eup %3537  ;;  %v2337_v41 = vmul.f32 %v4514_v45, %v4439_v43 }
0x122e   :  { %v2340_v49 = vmul.f32 %v4519_v58, %v4447_v33 }
0x1234   :  { %v4522_v57 = vpop.eup %3539 }
0x1235   :  { %v4528_v30 = vpop.eup %3541  ;;  %v2339_v61 = vmul.f32 %v4522_v57, %v4449_v5 }
0x1236   :  { %v2341_v11 = vmul.f32 %v4528_v30, %v4455_v23 }
0x1284   :  { %v2351_v16 = vpop.permute.xlu0 %2350 }
0x1285   :  { %v2374_v0 = vmul.f32 %v4500_v28, %v2351_v16 }
0x1286   :  { %v2355_v2 = vpop.permute.xlu1 %2354 }
0x1287   :  { %2390 = vrot.lane.b32.xlu0 %v2374_v0, %s3652_s7  ;;  %v2376_v9 = vmul.f32 %v4506_v20, %v2355_v2 }
0x1288   :  { %v2353_v19 = vpop.permute.xlu0 %2352 }
0x1289   :  { %v2375_v53 = vmul.f32 %v4504_v39, %v2353_v19  ;;  %2394 = vrot.lane.b32.xlu1 %v2376_v9, %s3652_s7 }
0x128a   :  { %v2357_v35 = vpop.permute.xlu1 %2356 }
0x128b   :  { %2392 = vrot.lane.b32.xlu0 %v2375_v53, %s3652_s7  ;;  %v2377_v26 = vmul.f32 %v4514_v45, %v2357_v35 }
0x128c   :  { %v2359_v54 = vpop.permute.xlu0 %2358 }
0x128d   :  { %v2378_v40 = vmul.f32 %v4511_v55, %v2359_v54  ;;  %2396 = vrot.lane.b32.xlu1 %v2377_v26, %s3652_s7 }
0x128e   :  { %v2361_v42 = vpop.permute.xlu1 %2360 }
0x128f   :  { %2398 = vrot.lane.b32.xlu0 %v2378_v40, %s3652_s7  ;;  %v2379_v31 = vmul.f32 %v4522_v57, %v2361_v42 }
0x1290   :  { %v2363_v59 = vpop.permute.xlu0 %2362 }
0x1291   :  { %v2380_v15 = vmul.f32 %v4519_v58, %v2363_v59  ;;  %2400 = vrot.lane.b32.xlu1 %v2379_v31, %s3652_s7 }
0x1292   :  { %v2365_v12 = vpop.permute.xlu1 %2364 }
0x1293   :  { %2402 = vrot.lane.b32.xlu0 %v2380_v15, %s3652_s7  ;;  %v2381_v21 = vmul.f32 %v4528_v30, %v2365_v12 }
0x1295   :  { %2404 = vrot.lane.b32.xlu1 %v2381_v21, %s3652_s7 }
0x12f9   :  { %v2391_v38 = vpop.permute.xlu0 %2390 }
0x12fa   :  { %v4534_v27 = vadd.f32 %v2391_v38, %v2334_v37 }
0x12fb   :  { %v2395_v29 = vpop.permute.xlu1 %2394 }
0x12fc   :  { %3543 = vtanh.f32 %v4534_v27  ;;  %v4543_v46 = vadd.f32 %v2395_v29, %v2336_v63 }
0x12fd   :  { %v2393_v48 = vpop.permute.xlu0 %2392 }
0x12fe   :  { %v4541_v44 = vadd.f32 %v2393_v48, %v2335_v22 }
0x12ff   :  { %v2397_v25 = vpop.permute.xlu1 %2396 }
0x1300   :  { %3545 = vtanh.f32 %v4541_v44  ;;  %v4554_v6 = vadd.f32 %v2397_v25, %v2337_v41 }
0x1301   :  { %3547 = vtanh.f32 %v4543_v46  ;;  %v2399_v36 = vpop.permute.xlu0 %2398 }
0x1302   :  { %v4551_v24 = vadd.f32 %v2399_v36, %v2338_v4 }
0x1303   :  { %v2401_v43 = vpop.permute.xlu1 %2400 }
0x1304   :  { %3549 = vtanh.f32 %v4551_v24  ;;  %v4564_v17 = vadd.f32 %v2401_v43, %v2339_v61 }
0x1305   :  { %3551 = vtanh.f32 %v4554_v6  ;;  %v2403_v52 = vpop.permute.xlu0 %2402 }
0x1306   :  { %v3544_v3 = vpop.eup %3543  ;;  %v4562_v51 = vadd.f32 %v2403_v52, %v2340_v49 }
0x1307   :  { %2438 = vrot.lane.b32.xlu0 %v3544_v3, %s3653_s8  ;;  %v2405_v33 = vpop.permute.xlu1 %2404 }
0x1308   :  { %3553 = vtanh.f32 %v4562_v51  ;;  %v4570_v34 = vadd.f32 %v2405_v33, %v2341_v11 }
0x1309   :  { %3555 = vtanh.f32 %v4564_v17 }
0x130a   :  { %v3546_v16 = vpop.eup %3545  ;;  %3557 = vtanh.f32 %v4570_v34 }
0x130b   :  { %v3548_v47 = vpop.eup %3547  ;;  %2440 = vrot.lane.b32.xlu0 %v3546_v16, %s3653_s8 }
0x130c   :  { %2442 = vrot.lane.b32.xlu1 %v3548_v47, %s3653_s8 }
0x130e   :  { %v3550_v5 = vpop.eup %3549 }
0x130f   :  { %v3552_v0 = vpop.eup %3551  ;;  %2446 = vrot.lane.b32.xlu0 %v3550_v5, %s3653_s8 }
0x1310   :  { %2444 = vrot.lane.b32.xlu1 %v3552_v0, %s3653_s8 }
0x1312   :  { %v3554_v8 = vpop.eup %3553 }
0x1313   :  { %v3556_v14 = vpop.eup %3555  ;;  %2450 = vrot.lane.b32.xlu0 %v3554_v8, %s3653_s8 }
0x1314   :  { %2448 = vrot.lane.b32.xlu1 %v3556_v14, %s3653_s8  ;;  %v3558_v23 = vpop.eup %3557 }
0x1318   :  { %2452 = vrot.lane.b32.xlu1 %v3558_v23, %s3653_s8 }
0x1379   :  { %v2439_v32 = vpop.permute.xlu0 %2438 }
0x137a   :  { %v2462_v50 = vmul.f32 %v4500_v28, %v2439_v32 }
0x137c   :  { %v2470_v54 = vpack.c.bf16 %v2462_v50, %v2462_v50  ;;  %v361_v50 = vrot.slane %v3785_v1, 7 }
0x137d   :  { %v2441_v19 = vpop.permute.xlu0 %2440 }
0x137e   :  { %v2443_v2 = vpop.permute.xlu1 %2442  ;;  %v2463_v53 = vmul.f32 %v4504_v39, %v2441_v19  ;;  %v2486_v21 = vunpack.c.l.b16 %v2470_v54  ;;  %v362_v19 = vrot.slane %v3778_v56, 7  ;;  %v366_v54 = vrot.slane %v3790_v7, 7 }
0x137f   :  { %v2464_v9 = vmul.f32 %v4506_v20, %v2443_v2  ;;  %v363_v2 = vrot.slane %v3782_v62, 7 }
0x1380   :  { %v2471_v35 = vpack.c.bf16 %v2463_v53, %v2463_v53  ;;  %v364_v53 = vrot.slane %v3792_v10, 7 }
0x1381   :  { %v2472_v40 = vpack.c.bf16 %v2464_v9, %v2464_v9  ;;  %v2447_v26 = vpop.permute.xlu0 %2446  ;;  %v365_v9 = vrot.slane %v3797_v18, 7 }
0x1382   :  { %v2487_v59 = vunpack.c.l.b16 %v2471_v35  ;;  %v2445_v42 = vpop.permute.xlu1 %2444  ;;  %v2466_v15 = vmul.f32 %v4511_v55, %v2447_v26  ;;  %v367_v35 = vrot.slane %v3794_v13, 7 }
0x1383   :  { %v2488_v31 = vunpack.c.l.b16 %v2472_v40  ;;  %v2465_v12 = vmul.f32 %v4514_v45, %v2445_v42 }
0x1384   :  { %v2494_v37 = vrot.slane %v2487_v59, 7  ;;  %v2474_v28 = vpack.c.bf16 %v2466_v15, %v2466_v15 }
0x1385   :  { %v2473_v38 = vpack.c.bf16 %v2465_v12, %v2465_v12  ;;  %v2451_v22 = vpop.permute.xlu0 %2450  ;;  %v2496_v63 = vrot.slane %v2488_v31, 6 }
0x1386   :  { %v2495_v39 = vsel %vm688_vm6, %v2494_v37, %v2486_v21  ;;  %v2490_v20 = vunpack.c.l.b16 %v2474_v28  ;;  %v2449_v48 = vpop.permute.xlu1 %2448  ;;  %v2468_v29 = vmul.f32 %v4519_v58, %v2451_v22 }
0x1387   :  { %v2489_v4 = vunpack.c.l.b16 %v2473_v38  ;;  %v2467_v3 = vmul.f32 %v4522_v57, %v2449_v48  ;;  %v2497_v55 = vsel %vm691_vm7, %v2496_v63, %v2495_v39 }
0x1388   :  { %v2500_v41 = vrot.slane %v2490_v20, 4  ;;  %v2476_v36 = vpack.c.bf16 %v2468_v29, %v2468_v29 }
0x1389   :  { %v2498_v45 = vrot.slane %v2489_v4, 5  ;;  %v2475_v25 = vpack.c.bf16 %v2467_v3, %v2467_v3 }
0x138a   :  { %v2492_v49 = vunpack.c.l.b16 %v2476_v36  ;;  %v2453_v61 = vpop.permute.xlu1 %2452 }
0x138b   :  { %v2499_v52 = vsel %vm694_vm8, %v2498_v45, %v2497_v55  ;;  %v2491_v43 = vunpack.c.l.b16 %v2475_v25  ;;  %v2469_v11 = vmul.f32 %v4528_v30, %v2453_v61  ;;  %v360_v30 = vrot.slane %v3780_v60, 7 }
0x138c   :  { %v2501_v16 = vsel %vm697_vm9, %v2500_v41, %v2499_v52  ;;  %v2504_v33 = vrot.slane %v2492_v49, 2 }
0x138d   :  { %v2502_v58 = vrot.slane %v2491_v43, 3  ;;  %v2477_v47 = vpack.c.bf16 %v2469_v11, %v2469_v11 }
0x138f   :  { %v2503_v57 = vsel %vm700_vm10, %v2502_v58, %v2501_v16  ;;  %v2493_v5 = vunpack.c.l.b16 %v2477_v47 }
0x1390   :  { %v2505_v0 = vsel %vm703_vm11, %v2504_v33, %v2503_v57 }
0x1391   :  { %v2506_v8 = vrot.slane %v2493_v5, 1 }
0x1393   :  { %v2507_v14 = vsel %vm706_vm12, %v2506_v8, %v2505_v0 }
0x1394   :  { %v2508_v23 = vpack.c.b16 %v2507_v14, %v2507_v14 }
0x1396   :  { %2509 = vrot.lane.b32.xlu0 %v2508_v23, %s3654_s9 }
0x1408   :  { %v2510_v32 = vpop.permute.xlu0 %2509 }
0x1409   :  { %3073 = vmatmul.mubr.msk.bf16.vlgmr.msra.gmra.mrb[20].mxu1 %vm403_vm13, %v2510_v32 }
0x14dc   :  { %v2548_v40 = vpop.f32.mrb[20].mxu1 }
0x14dd   :  { %v2555_v26 = vrot.slane %v2548_v40, 1  ;;  %v2556_v59 = vrot.slane %v2548_v40, 2  ;;  %v2557_v42 = vrot.slane %v2548_v40, 3  ;;  %v2558_v15 = vrot.slane %v2548_v40, 4  ;;  %v3074_v60 = vpop.f32.mrb[21].mxu1 }
0x14de   :  { %v2559_v31 = vrot.slane %v2548_v40, 5  ;;  %v2560_v1 = vrot.slane %v2548_v40, 6  ;;  %v2561_v12 = vrot.slane %v2548_v40, 7  ;;  %v2570_v56 = vadd.f32 %v2548_v40, %v360_v30  ;;  %v2551_v21 = vpop.f32.mrb[22].mxu1 }
0x14df   :  { %v2571_v62 = vadd.f32 %v2555_v26, %v361_v50  ;;  %v2572_v37 = vadd.f32 %v2556_v59, %v362_v19  ;;  %v2573_v10 = vadd.f32 %v2557_v42, %v363_v2  ;;  %v2574_v28 = vadd.f32 %v2558_v15, %v364_v53  ;;  %v3075_v18 = vpop.f32.mrb[23].mxu1 }
0x14e0   :  { %v2575_v38 = vadd.f32 %v2559_v31, %v365_v9  ;;  %v2576_v7 = vadd.f32 %v2560_v1, %v366_v54  ;;  %v2577_v22 = vadd.f32 %v2561_v12, %v367_v35  ;;  %3559 = vtanh.f32 %v2570_v56 }
0x14e1   :  { %3561 = vtanh.f32 %v2571_v62  ;;  %v2963_v55 = vmul.f32 -1.442695, %v2570_v56  ;;  %v2964_v41 = vmul.f32 -1.442695, %v2571_v62  ;;  %v2965_v36 = vmul.f32 -1.442695, %v2572_v37 }
0x14e2   :  { %3563 = vtanh.f32 %v2572_v37  ;;  %v2967_v45 = vmul.f32 -1.442695, %v2574_v28  ;;  %v2966_v49 = vmul.f32 -1.442695, %v2573_v10  ;;  %v2969_v61 = vmul.f32 -1.442695, %v2576_v7 }
0x14e3   :  { %3565 = vtanh.f32 %v2574_v28  ;;  %v2968_v43 = vmul.f32 -1.442695, %v2575_v38  ;;  %v2970_v11 = vmul.f32 -1.442695, %v2577_v22 }
0x14e4   :  { %3567 = vtanh.f32 %v2573_v10 }
0x14e5   :  { %3569 = vtanh.f32 %v2576_v7 }
0x14e6   :  { %3571 = vtanh.f32 %v2575_v38 }
0x14e7   :  { %3573 = vtanh.f32 %v2577_v22 }
0x14e8   :  { %3575 = vpow2.f32 %v2963_v55 }
0x14e9   :  { %3577 = vpow2.f32 %v2964_v41 }
0x14ea   :  { %v3560_v13 = vpop.eup %3559  ;;  %3579 = vpow2.f32 %v2965_v36 }
0x14eb   :  { %2650 = vrot.lane.b32.xlu1 %v3560_v13, %s3651_s0  ;;  %v3562_v63 = vpop.eup %3561  ;;  %3581 = vpow2.f32 %v2967_v45 }
0x14ec   :  { %v3564_v39 = vpop.eup %3563  ;;  %3583 = vpow2.f32 %v2966_v49 }
0x14ed   :  { %2654 = vrot.lane.b32.xlu0 %v3564_v39, %s3651_s0  ;;  %v3566_v20 = vpop.eup %3565  ;;  %3585 = vpow2.f32 %v2969_v61 }
0x14ee   :  { %v3568_v48 = vpop.eup %3567 }
0x14ef   :  { %2652 = vrot.lane.b32.xlu1 %v3562_v63, %s3651_s0  ;;  %v3570_v29 = vpop.eup %3569 }
0x14f0   :  { %v3572_v4 = vpop.eup %3571 }
0x14f1   :  { %2656 = vrot.lane.b32.xlu0 %v3568_v48, %s3651_s0  ;;  %v3574_v3 = vpop.eup %3573 }
0x14f2   :  { %v3576_v25 = vpop.eup %3575 }
0x14f3   :  { %2658 = vrot.lane.b32.xlu1 %v3566_v20, %s3651_s0  ;;  %v2602_v52 = vadd.f32 1.0, %v3576_v25  ;;  %v3578_v16 = vpop.eup %3577 }
0x14f4   :  { %v3580_v33 = vpop.eup %3579  ;;  %v2603_v58 = vadd.f32 1.0, %v3578_v16 }
0x14f5   :  { %2660 = vrot.lane.b32.xlu0 %v3572_v4, %s3651_s0  ;;  %3587 = vrcp.f32 %v2602_v52  ;;  %v3582_v47 = vpop.eup %3581  ;;  %v2604_v57 = vadd.f32 1.0, %v3580_v33 }
0x14f6   :  { %3589 = vpow2.f32 %v2968_v43  ;;  %v3584_v5 = vpop.eup %3583  ;;  %v2606_v8 = vadd.f32 1.0, %v3582_v47 }
0x14f7   :  { %2662 = vrot.lane.b32.xlu1 %v3570_v29, %s3651_s0  ;;  %3591 = vpow2.f32 %v2970_v11  ;;  %v3586_v0 = vpop.eup %3585  ;;  %v2605_v32 = vadd.f32 1.0, %v3584_v5  ;;  %v3655_v5 = vmov 0.0|0.0  }
0x14f8   :  { %3593 = vrcp.f32 %v2603_v58  ;;  %v2608_v19 = vadd.f32 1.0, %v3586_v0  ;;  %3083 = vmatprep.subr.bf16.mxu0 %v3655_v5 }
0x14f9   :  { %2664 = vrot.lane.b32.xlu0 %v3574_v3, %s3651_s0  ;;  %3595 = vrcp.f32 %v2604_v57  ;;  %v30_v57 = vld [vmem:[%s4711_s3 + $0x1] sm:$0xff] }
0x14fa   :  { %3597 = vrcp.f32 %v2606_v8 }
0x14fb   :  { %3599 = vrcp.f32 %v2605_v32 }
0x14fc   :  { %3601 = vrcp.f32 %v2608_v19 }
0x14ff   :  { %v4613_v14 = vpop.eup %3587 }
0x1500   :  { %v3590_v30 = vpop.eup %3589  ;;  %v2634_v13 = vmul.f32 %v4613_v14, %v4534_v27 }
0x1501   :  { %v2607_v2 = vadd.f32 1.0, %v3590_v30  ;;  %v3592_v53 = vpop.eup %3591 }
0x1502   :  { %v2609_v9 = vadd.f32 1.0, %v3592_v53  ;;  %v4617_v54 = vpop.eup %3593 }
0x1503   :  { %3603 = vrcp.f32 %v2607_v2  ;;  %v4619_v40 = vpop.eup %3595  ;;  %v2635_v20 = vmul.f32 %v4617_v54, %v4541_v44 }
0x1504   :  { %3605 = vrcp.f32 %v2609_v9  ;;  %v4624_v15 = vpop.eup %3597  ;;  %v2636_v48 = vmul.f32 %v4619_v40, %v4543_v46 }
0x1505   :  { %v4627_v31 = vpop.eup %3599  ;;  %v2638_v41 = vmul.f32 %v4624_v15, %v4551_v24 }
0x1506   :  { %v4632_v21 = vpop.eup %3601  ;;  %v2637_v27 = vmul.f32 %v4627_v31, %v4554_v6 }
0x1507   :  { %v2640_v46 = vmul.f32 %v4632_v21, %v4562_v51 }
0x150d   :  { %v4635_v37 = vpop.eup %3603 }
0x150e   :  { %v4641_v38 = vpop.eup %3605  ;;  %v2639_v61 = vmul.f32 %v4635_v37, %v4564_v17 }
0x150f   :  { %v2641_v6 = vmul.f32 %v4641_v38, %v4570_v34  ;;  %v31_v34 = vld [vmem:[%s4711_s3 + $0x9] sm:$0xff] }
0x1510   :  { %v3084_v0 = vpack.c.bf16 %v31_v34, %v30_v57 }
0x1512   :  { %3085 = vmatpush3.bf16.msra.mxu0 %v3084_v0 }
0x155d   :  { %v2651_v23 = vpop.permute.xlu1 %2650 }
0x155e   :  { %v2674_v50 = vmul.f32 %v4613_v14, %v2651_v23 }
0x155f   :  { %v2655_v26 = vpop.permute.xlu0 %2654 }
0x1560   :  { %2690 = vrot.lane.b32.xlu1 %v2674_v50, %s3652_s7  ;;  %v2676_v42 = vmul.f32 %v4619_v40, %v2655_v26 }
0x1561   :  { %v2653_v35 = vpop.permute.xlu1 %2652 }
0x1562   :  { %v2675_v59 = vmul.f32 %v4617_v54, %v2653_v35  ;;  %2694 = vrot.lane.b32.xlu0 %v2676_v42, %s3652_s7 }
0x1563   :  { %v2657_v1 = vpop.permute.xlu0 %2656 }
0x1564   :  { %2692 = vrot.lane.b32.xlu1 %v2675_v59, %s3652_s7  ;;  %v2677_v56 = vmul.f32 %v4627_v31, %v2657_v1 }
0x1565   :  { %v2659_v60 = vpop.permute.xlu1 %2658 }
0x1566   :  { %v2678_v12 = vmul.f32 %v4624_v15, %v2659_v60  ;;  %2696 = vrot.lane.b32.xlu0 %v2677_v56, %s3652_s7 }
0x1567   :  { %v2661_v10 = vpop.permute.xlu0 %2660 }
0x1568   :  { %2698 = vrot.lane.b32.xlu1 %v2678_v12, %s3652_s7  ;;  %v2679_v18 = vmul.f32 %v4635_v37, %v2661_v10 }
0x1569   :  { %v2663_v62 = vpop.permute.xlu1 %2662 }
0x156a   :  { %v2680_v28 = vmul.f32 %v4632_v21, %v2663_v62  ;;  %2700 = vrot.lane.b32.xlu0 %v2679_v18, %s3652_s7 }
0x156b   :  { %v2665_v7 = vpop.permute.xlu0 %2664 }
0x156c   :  { %2702 = vrot.lane.b32.xlu1 %v2680_v28, %s3652_s7  ;;  %v2681_v22 = vmul.f32 %v4641_v38, %v2665_v7 }
0x156e   :  { %2704 = vrot.lane.b32.xlu0 %v2681_v22, %s3652_s7 }
0x15d2   :  { %v2691_v63 = vpop.permute.xlu1 %2690 }
0x15d3   :  { %v2714_v39 = vadd.f32 %v2691_v63, %v2634_v13 }
0x15d4   :  { %v2695_v4 = vpop.permute.xlu0 %2694 }
0x15d5   :  { %3607 = vtanh.f32 %v2714_v39  ;;  %v2716_v55 = vadd.f32 %v2695_v4, %v2636_v48 }
0x15d6   :  { %v2693_v29 = vpop.permute.xlu1 %2692 }
0x15d7   :  { %v2715_v3 = vadd.f32 %v2693_v29, %v2635_v20 }
0x15d8   :  { %v2697_v25 = vpop.permute.xlu0 %2696 }
0x15d9   :  { %3609 = vtanh.f32 %v2715_v3  ;;  %v2717_v44 = vadd.f32 %v2697_v25, %v2637_v27 }
0x15da   :  { %3611 = vtanh.f32 %v2716_v55  ;;  %v2699_v45 = vpop.permute.xlu1 %2698 }
0x15db   :  { %v2718_v49 = vadd.f32 %v2699_v45, %v2638_v41 }
0x15dc   :  { %v2701_v52 = vpop.permute.xlu0 %2700 }
0x15dd   :  { %3613 = vtanh.f32 %v2718_v49  ;;  %v2719_v11 = vadd.f32 %v2701_v52, %v2639_v61 }
0x15de   :  { %3615 = vtanh.f32 %v2717_v44  ;;  %v2703_v24 = vpop.permute.xlu1 %2702 }
0x15df   :  { %v3608_v36 = vpop.eup %3607  ;;  %v2720_v43 = vadd.f32 %v2703_v24, %v2640_v46 }
0x15e0   :  { %2738 = vrot.lane.b32.xlu1 %v3608_v36, %s3653_s8  ;;  %v2705_v33 = vpop.permute.xlu0 %2704 }
0x15e1   :  { %3617 = vtanh.f32 %v2720_v43  ;;  %v2721_v47 = vadd.f32 %v2705_v33, %v2641_v6 }
0x15e2   :  { %3619 = vtanh.f32 %v2719_v11 }
0x15e3   :  { %v3610_v16 = vpop.eup %3609  ;;  %3621 = vtanh.f32 %v2721_v47 }
0x15e4   :  { %v3612_v58 = vpop.eup %3611  ;;  %2740 = vrot.lane.b32.xlu1 %v3610_v16, %s3653_s8 }
0x15e5   :  { %2742 = vrot.lane.b32.xlu0 %v3612_v58, %s3653_s8 }
0x15e7   :  { %v3614_v51 = vpop.eup %3613 }
0x15e8   :  { %v3616_v17 = vpop.eup %3615  ;;  %2746 = vrot.lane.b32.xlu1 %v3614_v51, %s3653_s8 }
0x15e9   :  { %2744 = vrot.lane.b32.xlu0 %v3616_v17, %s3653_s8 }
0x15eb   :  { %v3618_v8 = vpop.eup %3617 }
0x15ec   :  { %v3620_v23 = vpop.eup %3619  ;;  %2750 = vrot.lane.b32.xlu1 %v3618_v8, %s3653_s8 }
0x15ed   :  { %2748 = vrot.lane.b32.xlu0 %v3620_v23, %s3653_s8  ;;  %v3622_v32 = vpop.eup %3621 }
0x15f1   :  { %2752 = vrot.lane.b32.xlu0 %v3622_v32, %s3653_s8 }
0x1652   :  { %v2739_v30 = vpop.permute.xlu1 %2738 }
0x1653   :  { %v2762_v9 = vmul.f32 %v4613_v14, %v2739_v30 }
0x1656   :  { %v2741_v50 = vpop.permute.xlu1 %2740 }
0x1657   :  { %v2743_v19 = vpop.permute.xlu0 %2742  ;;  %v2763_v2 = vmul.f32 %v4617_v54, %v2741_v50 }
0x1658   :  { %v2764_v53 = vmul.f32 %v4619_v40, %v2743_v19 }
0x1659   :  { %v2782_v35 = vrot.slane %v2763_v2, 7 }
0x165a   :  { %v2747_v26 = vpop.permute.xlu1 %2746  ;;  %v2784_v59 = vrot.slane %v2764_v53, 6 }
0x165b   :  { %v2783_v42 = vsel %vm688_vm6, %v2782_v35, %v2762_v9  ;;  %v2745_v60 = vpop.permute.xlu0 %2744  ;;  %v2766_v1 = vmul.f32 %v4624_v15, %v2747_v26 }
0x165c   :  { %v2765_v12 = vmul.f32 %v4627_v31, %v2745_v60  ;;  %v2785_v56 = vsel %vm691_vm7, %v2784_v59, %v2783_v42 }
0x165d   :  { %v2788_v62 = vrot.slane %v2766_v1, 4 }
0x165e   :  { %v2786_v10 = vrot.slane %v2765_v12, 5  ;;  %v2751_v28 = vpop.permute.xlu1 %2750 }
0x165f   :  { %v2749_v54 = vpop.permute.xlu0 %2748  ;;  %v2768_v40 = vmul.f32 %v4632_v21, %v2751_v28 }
0x1660   :  { %v2787_v14 = vsel %vm694_vm8, %v2786_v10, %v2785_v56  ;;  %v2767_v18 = vmul.f32 %v4635_v37, %v2749_v54  ;;  %v2971_v37 = vld [vmem:[%s4711_s3 + $0x11] ss:$0 sm:$0xff] }
0x1661   :  { %v2789_v7 = vsel %vm697_vm9, %v2788_v62, %v2787_v14  ;;  %v2792_v22 = vrot.slane %v2768_v40, 2 }
0x1662   :  { %v2790_v13 = vrot.slane %v2767_v18, 3 }
0x1663   :  { %v2753_v63 = vpop.permute.xlu0 %2752 }
0x1664   :  { %v2791_v15 = vsel %vm700_vm10, %v2790_v13, %v2789_v7  ;;  %v2769_v31 = vmul.f32 %v4641_v38, %v2753_v63 }
0x1665   :  { %v2793_v39 = vsel %vm703_vm11, %v2792_v22, %v2791_v15 }
0x1666   :  { %v2794_v20 = vrot.slane %v2769_v31, 1 }
0x1668   :  { %v2795_v48 = vsel %vm706_vm12, %v2794_v20, %v2793_v39 }
0x1669   :  { %2796 = vrot.lane.b32.xlu1 %v2795_v48, %s3654_s9 }
0x16db   :  { %v2797_v21 = vpop.permute.xlu1 %2796 }
0x16dc   :  { %3081 = vmatmul.mubr.msk.f32.vlgmr.msra.gmra.mrb[16].mxu0 %vm403_vm13, %v2797_v21 }
0x17af   :  { %v2866_v29 = vpop.f32.mrb[16].mxu0 }
0x17b0   :  { %v2867_v4 = vadd.f32 %v2971_v37, %v2866_v29  ;;  %v3082_v3 = vpop.f32.mrb[17].mxu0 }
0x17b2   :  { %2870 = vst.msk [vmem:[#allocation2] sm:$0xff] %vm63_vm2, %v2867_v4 }
0x17b3   :  { %3634 = shalt.err (!%p3631_p4)
}
0x17b4   :  { %s3635_s1 = scalar_lea.hbm %s4712_s4, 128 }
0x17b5   :  { %p3636_p5 = scmp.ne.s32.totalorder %s4712_s4, %s3635_s1  ;;  %p3639_p6 = scmp.lt.u32.totalorder %s3635_s1, %s4712_s4 }
0x17b7   :  { %p3641_p7 = pnand %p3639_p6, %p3636_p5 }
0x17b9   :  { %3644 = shalt.err (!%p3641_p7)
}
0x17ba   :  { %2880 = dma.vmem_to_hbm [thread:$0]  %s2878_s17, 128, %s4712_s4, [#allocation3]  }
0x17bb   :  { %3645 = dma.done.wait [#allocation3], 128  }
0x17bc   :  { %3646 = vsyncadd [#allocation3], 4294967168 }
0x17bd   :  { %2884 = vsyncpa [#allocation3], 1 }

</bundles_post_ra>
